<compile_context>
chip_gen: v7x
topology: tpu7x:2x2x1
jax: 0.10.0
libtpu: 0.0.40
codegen_flags: <defaults>
</compile_context>

<pallas_src>
import functools
import math

import jax
import jax.numpy as jnp
from jax.experimental import pallas as pl
from jax.experimental.pallas import tpu as pltpu


# ---------------------------------------------------------------------------
# Pallas kernel 1: row-tiled fused Linear (multi-input, per-column-range acts)
# ---------------------------------------------------------------------------
def _apply_act(y, act):
    if act == "elu1":                                  # elu(y) + 1
        return jnp.where(y > 0, y + 1.0, jnp.exp(jnp.minimum(y, 0.0)))
    if act == "relu":
        return jnp.maximum(y, 0.0)
    return y


def _fused_linear_kernel(*refs, n_inputs, segments):
    # refs = (x_0..x_{k-1}, w_0..w_{k-1}, bias, out)
    xs = refs[:n_inputs]
    ws = refs[n_inputs:2 * n_inputs]
    b_ref = refs[2 * n_inputs]
    o_ref = refs[2 * n_inputs + 1]

    y = b_ref[...].astype(jnp.float32)                 # (1, N) -> broadcasts
    for x_ref, w_ref in zip(xs, ws):
        y = y + jnp.dot(x_ref[...].astype(jnp.float32),
                        w_ref[...].astype(jnp.float32),
                        preferred_element_type=jnp.float32)

    n_out = y.shape[-1]
    acts = {a for _, _, a in segments}
    if acts and acts != {"none"}:
        if len(segments) == 1 and segments[0][0] == 0 and segments[0][1] == n_out:
            y = _apply_act(y, segments[0][2])
        else:
            col = jax.lax.broadcasted_iota(jnp.int32, y.shape, 1)
            for start, end, act in segments:
                if act == "none":
                    continue
                y = jnp.where((col >= start) & (col < end), _apply_act(y, act), y)
    o_ref[...] = y.astype(o_ref.dtype)


def _pick_row_tile(rows, k_list, n_out, budget_bytes=8 << 20):
    """Row-tile heuristic: multiple of 8, VMEM-budgeted, >= 2 grid steps."""
    # Budget sized conservatively against v5e's 16 MiB scoped-VMEM default;
    # count the VMEM-resident weight/bias blocks too (double-buffered f32).
    bytes_fixed = 8 * (sum(k_list) * n_out + n_out)
    bytes_per_row = 8 * (sum(k_list) + n_out)          # x tiles + out tile (x2 buf)
    avail = max(budget_bytes - bytes_fixed, bytes_per_row * 8)
    tm = min(rows, avail // bytes_per_row)
    tm = max(8, (tm // 8) * 8)                         # never a huge ragged block
    # Keep >= 2 grid steps so both of v7x's TensorCores are used.
    half = max(8, ((rows + 1) // 2 + 7) // 8 * 8)
    return min(tm, half)


def pallas_fused_linear(xs, ws, bias, segments=()):
    """sum_i xs[i] @ ws[i] + bias, with per-column-range fused activations."""
    rows = xs[0].shape[0]
    k_list = [x.shape[1] for x in xs]
    n_out = ws[0].shape[1]
    tm = _pick_row_tile(rows, k_list, n_out)
    grid = (pl.cdiv(rows, tm),)                        # ragged tail handled by Pallas
    kernel = functools.partial(_fused_linear_kernel, n_inputs=len(xs),
                               segments=tuple(segments))
    in_specs = (
        [pl.BlockSpec((tm, kk), lambda i: (i, 0)) for kk in k_list]
        + [pl.BlockSpec((kk, n_out), lambda i: (0, 0)) for kk in k_list]  # resident W
        + [pl.BlockSpec((1, n_out), lambda i: (0, 0))]                    # resident b
    )
    return pl.pallas_call(
        kernel,
        out_shape=jax.ShapeDtypeStruct((rows, n_out), xs[0].dtype),
        grid_spec=pltpu.PrefetchScalarGridSpec(
            num_scalar_prefetch=0,
            grid=grid,
            in_specs=in_specs,
            out_specs=pl.BlockSpec((tm, n_out), lambda i: (i, 0)),
        ),
        compiler_params=pltpu.CompilerParams(dimension_semantics=("parallel",)),
    )(*xs, *ws, bias.reshape(1, n_out))


# ---------------------------------------------------------------------------
# Pallas kernel 2: linear-attention core, all heads per batch, fused RoPE
# ---------------------------------------------------------------------------
def _linattn_kernel(q_ref, kv_ref, rq_ref, rk_ref, pm_ref, o_ref, *, inv_n):
    # Per-batch, transposed (channels, tokens) layout: tokens ride the 128 lanes.
    q = q_ref[0].astype(jnp.float32)                   # (c, n)
    k = kv_ref[0, 0].astype(jnp.float32)               # (c, m)
    v = kv_ref[0, 1].astype(jnp.float32)               # (c, m)
    swap = pm_ref[0].astype(jnp.float32)               # (c, c) adjacent-pair permutation
    head = pm_ref[1].astype(jnp.float32)               # (c, c) same-head block mask

    # RoPE fused in-kernel: rot(x) = cos*x + sin_signed * (P @ x).
    qr = (rq_ref[0].astype(jnp.float32) * q
          + rq_ref[1].astype(jnp.float32)
          * jnp.dot(swap, q, preferred_element_type=jnp.float32))
    kr = (rk_ref[0].astype(jnp.float32) * k
          + rk_ref[1].astype(jnp.float32)
          * jnp.dot(swap, k, preferred_element_type=jnp.float32))

    # z = 1 / (q . mean_m(k) + eps), per head, broadcast to that head's channels.
    k_mean = jnp.mean(k, axis=1, keepdims=True)                             # (c, 1)
    den = jnp.dot(head, q * k_mean, preferred_element_type=jnp.float32) + 1e-6
    z = pl.reciprocal(den, approx=True)                                     # (c, n)

    # kv[e, d] = sum_m v[e, m] * kr[d, m]; keep only same-head pairs (block diag).
    kv = jax.lax.dot_general(v, kr, (((1,), (1,)), ((), ())),
                             preferred_element_type=jnp.float32) * head     # (c, c)
    out = jnp.dot(kv, qr, preferred_element_type=jnp.float32) * (inv_n * z)
    o_ref[0] = out.astype(o_ref.dtype)


def pallas_linear_attention(q_t, kv_t, rope_q, rope_k, pm, n_tokens):
    """q_t: (B, c, n); kv_t: (B, 2, c, m) = [k, v]; constants rope_q/rope_k/pm."""
    b, c, n = q_t.shape
    m = kv_t.shape[3]
    kernel = functools.partial(_linattn_kernel, inv_n=1.0 / float(n_tokens))
    return pl.pallas_call(
        kernel,
        out_shape=jax.ShapeDtypeStruct((b, c, n), q_t.dtype),
        grid_spec=pltpu.PrefetchScalarGridSpec(
            num_scalar_prefetch=0,
            grid=(b,),
            in_specs=[
                pl.BlockSpec((1, c, n), lambda i: (i, 0, 0)),
                pl.BlockSpec((1, 2, c, m), lambda i: (i, 0, 0, 0)),
                pl.BlockSpec((2, c, n), lambda i: (0, 0, 0)),     # resident tables
                pl.BlockSpec((2, c, m), lambda i: (0, 0, 0)),
                pl.BlockSpec((2, c, c), lambda i: (0, 0, 0)),
            ],
            out_specs=pl.BlockSpec((1, c, n), lambda i: (i, 0, 0)),
        ),
        compiler_params=pltpu.CompilerParams(dimension_semantics=("parallel",)),
    )(q_t, kv_t, rope_q, rope_k, pm)


# ---------------------------------------------------------------------------
# Pure-JAX references (used for in-script verification of the Pallas path)
# ---------------------------------------------------------------------------
def _linear_ref(x2d, w, bias, activation="none"):
    y = jnp.dot(x2d, w, precision=jax.lax.Precision.HIGHEST) + bias[None, :]
    if activation == "elu1":
        y = jnp.where(y > 0, y + 1.0, jnp.exp(jnp.minimum(y, 0.0)))
    elif activation == "relu":
        y = jnp.maximum(y, 0.0)
    return y


def _linattn_ref(qh, kh, vh, qrh, krh, n_tokens):
    # (b*heads, hd, tokens) transposed per-head layout.
    k_mean = jnp.mean(kh, axis=2, keepdims=True)
    denom = jnp.sum(qh * k_mean, axis=1, keepdims=True) + 1e-6
    z = 1.0 / denom
    kv_t = jnp.einsum("bem,bdm->bed", vh, krh,
                      precision=jax.lax.Precision.HIGHEST) * (1.0 / n_tokens)
    return jnp.einsum("bed,bdn->ben", kv_t, qrh,
                      precision=jax.lax.Precision.HIGHEST) * z


def apply_rope(x, cos, sin):
    b, length, c = x.shape
    xr = x.reshape(b, length, c // 2, 2)
    re, im = xr[..., 0], xr[..., 1]
    o_re = cos[None] * re - sin[None] * im
    o_im = sin[None] * re + cos[None] * im
    return jnp.stack([o_re, o_im], axis=-1).reshape(b, length, c)


# ---------------------------------------------------------------------------
# Plain-JAX plumbing (RoPE tables, Haar DWT/IDWT, convs, BN)
# ---------------------------------------------------------------------------
def rope_tables(h, w, c, base=10000.0):
    k_max = c // (2 * 2)
    theta = 1.0 / base ** (jnp.arange(k_max, dtype=jnp.float32) / k_max)
    gi, gj = jnp.meshgrid(jnp.arange(h, dtype=jnp.float32),
                          jnp.arange(w, dtype=jnp.float32), indexing="ij")
    angles = jnp.concatenate([gi[..., None] * theta, gj[..., None] * theta],
                             axis=-1)                                # (h, w, c//2)
    return (jnp.cos(angles).reshape(h * w, c // 2),
            jnp.sin(angles).reshape(h * w, c // 2))


def _rope_kernel_mats(cos, sin):
    # (tokens, c//2) tables -> (2, c, tokens): [cos per channel, signed sin].
    tokens, half = cos.shape
    c = 2 * half
    pair = jnp.arange(c) // 2
    sign = jnp.where(jnp.arange(c) % 2 == 0, -1.0, 1.0)   # even ch: -sin, odd: +sin
    cos_t = cos[:, pair].T
    sin_t = (sin[:, pair] * sign[None, :]).T
    return jnp.stack([cos_t, sin_t], axis=0).astype(jnp.float32)


def haar_dwt2d(x):
    a = x[:, :, 0::2, 0::2]
    b = x[:, :, 0::2, 1::2]
    c = x[:, :, 1::2, 0::2]
    d = x[:, :, 1::2, 1::2]
    ll = (a + b + c + d) * 0.5
    lh = (a - b + c - d) * 0.5
    hl = (a + b - c - d) * 0.5
    hh = (a - b - c + d) * 0.5
    return ll, jnp.stack([lh, hl, hh], axis=2)


def haar_idwt2d(ll, yh):
    lh, hl, hh = yh[:, :, 0], yh[:, :, 1], yh[:, :, 2]
    a = (ll + lh + hl + hh) * 0.5
    b = (ll - lh + hl - hh) * 0.5
    c = (ll + lh - hl - hh) * 0.5
    d = (ll - lh - hl + hh) * 0.5
    bsz, ch, h2, w2 = ll.shape
    out = jnp.zeros((bsz, ch, h2 * 2, w2 * 2), ll.dtype)
    out = out.at[:, :, 0::2, 0::2].set(a)
    out = out.at[:, :, 0::2, 1::2].set(b)
    out = out.at[:, :, 1::2, 0::2].set(c)
    out = out.at[:, :, 1::2, 1::2].set(d)
    return out


def conv2d(x, w, b, groups=1):
    y = jax.lax.conv_general_dilated(
        x, w, window_strides=(1, 1), padding=((1, 1), (1, 1)),
        dimension_numbers=("NCHW", "OIHW", "NCHW"),
        feature_group_count=groups)
    return y + b[None, :, None, None]


def bn_relu_eval(x, gamma, beta, eps=1e-5):
    # TODO(synk): BatchNorm uses eval-mode running stats (mean=0, var=1) of a
    # freshly initialised module; training-mode batch statistics not implemented.
    scale = gamma / jnp.sqrt(1.0 + eps)
    return jnp.maximum(x * scale[None, :, None, None]
                       + beta[None, :, None, None], 0.0)


# ---------------------------------------------------------------------------
# Full LinearAttention forward
# ---------------------------------------------------------------------------
def linear_attention_forward(x, p, *, num_heads, sr_ratio=1, use_pallas=True):
    b, n, c = x.shape
    h = w = int(round(math.sqrt(n)))
    hd = c // num_heads
    x = x.astype(jnp.float32)
    x2 = x.reshape(b * n, c)

    if use_pallas:
        # Fused q / v / reduce projection: one call, 72-lane output slab.
        w_qvr = jnp.concatenate([p["wq"], p["wv"], p["w_red"]], axis=1)
        b_qvr = jnp.concatenate([p["bq"], p["bv"], p["b_red"]], axis=0)
        segs = ((0, c, "elu1"), (c, 2 * c, "none"), (2 * c, 2 * c + c // 4, "relu"))
        qvr = pallas_fused_linear([x2], [w_qvr], b_qvr, segments=segs)
        q = qvr[:, :c].reshape(b, n, c)
        vv = qvr[:, c:2 * c].reshape(b, n, c)
        red = qvr[:, 2 * c:]
    else:
        q = _linear_ref(x2, p["wq"], p["bq"], activation="elu1").reshape(b, n, c)
        vv = _linear_ref(x2, p["wv"], p["bv"]).reshape(b, n, c)
        red = _linear_ref(x2, p["w_red"], p["b_red"], activation="relu")

    red_img = red.reshape(b, h, w, c // 4).transpose(0, 3, 1, 2)

    # Haar DWT / filter / IDWT branch (plain JAX).
    ll, yh = haar_dwt2d(red_img)
    x_dwt = jnp.concatenate([ll, yh[:, :, 0], yh[:, :, 1], yh[:, :, 2]], axis=1)
    x_dwt = bn_relu_eval(conv2d(x_dwt, p["w_filt"], p["b_filt"]),
                         p["gamma_filt"], p["beta_filt"])
    x_idwt = haar_idwt2d(ll, yh)
    x_idwt = x_idwt.reshape(b, c // 4, h * w).transpose(0, 2, 1)      # (b, n, c//4)

    # kv tokens (sr_ratio == 1 -> kv_embed is Identity).
    # TODO(synk): strided kv_embed conv for sr_ratio > 1 is not implemented.
    kv_tok = x_dwt.reshape(b, c, -1).transpose(0, 2, 1)               # (b, m, c)
    m = kv_tok.shape[1]

    if use_pallas:
        k = pallas_fused_linear([kv_tok.reshape(b * m, c)], [p["wk"]], p["bk"],
                                segments=((0, c, "elu1"),)).reshape(b, m, c)
    else:
        k = _linear_ref(kv_tok.reshape(b * m, c), p["wk"], p["bk"],
                        activation="elu1").reshape(b, m, c)
    v = kv_tok

    if use_pallas:
        # Attention core: grid over batch, all heads per step, RoPE fused.
        q_t = q.transpose(0, 2, 1)                                    # (b, c, n)
        kv_t = jnp.stack([k.transpose(0, 2, 1), v.transpose(0, 2, 1)], axis=1)
        attn = pallas_linear_attention(q_t, kv_t, p["rope_q"], p["rope_k"],
                                       p["pm"], n).transpose(0, 2, 1)  # (b, n, c)
    else:
        q_rope = apply_rope(q, p["cos1"], p["sin1"])
        k_rope = apply_rope(k, p["cos2"], p["sin2"])

        def to_heads_t(t, length):
            return (t.reshape(b, length, num_heads, hd)
                     .transpose(0, 2, 3, 1)
                     .reshape(b * num_heads, hd, length))

        attn_t = _linattn_ref(to_heads_t(q, n), to_heads_t(k, m), to_heads_t(v, m),
                              to_heads_t(q_rope, n), to_heads_t(k_rope, m), n)
        attn = (attn_t.reshape(b, num_heads, hd, n)
                      .transpose(0, 3, 1, 2)
                      .reshape(b, n, c))

    # LePE: depthwise 3x3 conv on vv, replicating the original reshape chain.
    vv_img = vv.transpose(0, 2, 1).reshape(b, h, w, c).transpose(0, 3, 1, 2)
    lepe = conv2d(vv_img, p["w_lepe"], p["b_lepe"], groups=c)
    attn = attn + lepe.transpose(0, 2, 3, 1).reshape(b, n, c)

    if use_pallas:
        # Final projection without materialising concat([attn, x_idwt]).
        out = pallas_fused_linear(
            [attn.reshape(b * n, c), x_idwt.reshape(b * n, c // 4)],
            [p["wp"][:c], p["wp"][c:]], p["bp"], segments=())
        return out.reshape(b, n, c)
    cat = jnp.concatenate([attn, x_idwt], axis=-1).reshape(b * n, c + c // 4)
    return _linear_ref(cat, p["wp"], p["bp"]).reshape(b, n, c)


# ---------------------------------------------------------------------------
# Deterministic parameter construction
# ---------------------------------------------------------------------------
def init_params(key, dim, num_heads, input_resolution, sr_ratio=1):
    c = dim
    hd = c // num_heads
    hres, wres = input_resolution
    ks = jax.random.split(key, 16)

    def linear_init(k, fan_in, fan_out):
        bound = 1.0 / math.sqrt(fan_in)
        kw, kb = jax.random.split(k)
        w = jax.random.uniform(kw, (fan_in, fan_out), jnp.float32, -bound, bound)
        b = jax.random.uniform(kb, (fan_out,), jnp.float32, -bound, bound)
        return w, b

    wq, bq = linear_init(ks[0], c, c)
    wk, bk = linear_init(ks[1], c, c)
    wv, bv = linear_init(ks[2], c, c)
    wp, bp = linear_init(ks[3], c + c // 4, c)

    # reduce: Conv1x1(c -> c//4), eval-mode BN folded into the weights.
    w_red, b_red = linear_init(ks[4], c, c // 4)
    gamma_r = 1.0 + 0.1 * jax.random.normal(ks[5], (c // 4,), jnp.float32)
    beta_r = 0.1 * jax.random.normal(ks[6], (c // 4,), jnp.float32)
    scale_r = gamma_r / jnp.sqrt(1.0 + 1e-5)
    w_red = w_red * scale_r[None, :]
    b_red = b_red * scale_r + beta_r

    # filter: Conv3x3(c -> c) + BN + ReLU.
    bound = 1.0 / math.sqrt(c * 9)
    w_filt = jax.random.uniform(ks[7], (c, c, 3, 3), jnp.float32, -bound, bound)
    b_filt = jax.random.uniform(ks[8], (c,), jnp.float32, -bound, bound)
    gamma_f = 1.0 + 0.1 * jax.random.normal(ks[9], (c,), jnp.float32)
    beta_f = 0.1 * jax.random.normal(ks[10], (c,), jnp.float32)

    # lepe: depthwise Conv3x3.
    bound = 1.0 / math.sqrt(9)
    w_lepe = jax.random.uniform(ks[11], (c, 1, 3, 3), jnp.float32, -bound, bound)
    b_lepe = jax.random.uniform(ks[12], (c,), jnp.float32, -bound, bound)

    cos1, sin1 = rope_tables(hres, wres, c)
    cos2, sin2 = rope_tables(hres // (sr_ratio * 2), wres // (sr_ratio * 2), c)

    # Constants consumed by the fused attention kernel.
    rope_q = _rope_kernel_mats(cos1, sin1)              # (2, c, n)
    rope_k = _rope_kernel_mats(cos2, sin2)              # (2, c, m)
    ch = jnp.arange(c)
    swap_mat = (ch[None, :] == (ch[:, None] ^ 1)).astype(jnp.float32)
    head_mat = ((ch[:, None] // hd) == (ch[None, :] // hd)).astype(jnp.float32)
    pm = jnp.stack([swap_mat, head_mat], axis=0)        # (2, c, c)

    return dict(wq=wq, bq=bq, wk=wk, bk=bk, wv=wv, bv=bv, wp=wp, bp=bp,
                w_red=w_red, b_red=b_red,
                w_filt=w_filt, b_filt=b_filt, gamma_filt=gamma_f, beta_filt=beta_f,
                w_lepe=w_lepe, b_lepe=b_lepe,
                cos1=cos1, sin1=sin1, cos2=cos2, sin2=sin2,
                rope_q=rope_q, rope_k=rope_k, pm=pm)


if __name__ == "__main__":
    B, DIM, HEADS, SR = 2, 32, 4, 1
    RES = (16, 16)
    N = RES[0] * RES[1]

    key = jax.random.PRNGKey(0)
    kx, kp = jax.random.split(key)
    x = jax.random.normal(kx, (B, N, DIM), dtype=jnp.float32)
    params = init_params(kp, DIM, HEADS, RES, SR)

    fwd = jax.jit(functools.partial(linear_attention_forward,
                                    num_heads=HEADS, sr_ratio=SR, use_pallas=True))
    ref = jax.jit(functools.partial(linear_attention_forward,
                                    num_heads=HEADS, sr_ratio=SR, use_pallas=False))

    y = jax.block_until_ready(fwd(x, params))
    y_ref = jax.block_until_ready(ref(x, params))

    assert y.shape == (B, N, DIM) and y.dtype == jnp.float32
    assert bool(jnp.all(jnp.isfinite(y)))
    max_err = float(jnp.max(jnp.abs(y - y_ref)))
    # Small slack over the previous 2e-3 bound to cover the approx reciprocal.
    assert max_err < 3e-3, f"max abs diff vs JAX reference: {max_err}"

    print("KERNEL_OK")
</pallas_src>

<mosaic_0001>
module attributes {stable_mosaic.version = 11 : i64} {
  func.func @_fused_linear_kernel(%arg0: i32, %arg1: memref<256x32xf32, #tpu.memory_space<vmem>>, %arg2: memref<32x72xf32, #tpu.memory_space<vmem>>, %arg3: memref<1x72xf32, #tpu.memory_space<vmem>>, %arg4: memref<256x72xf32, #tpu.memory_space<vmem>>) attributes {dimension_semantics = [#tpu.dimension_semantics<parallel>], iteration_bounds = array<i64: 2>, scalar_prefetch = 0 : i64, scratch_operands = 0 : i64, tpu.core_type = #tpu.core_type<tc>, window_params = [{transform_indices = @transform_0, window_bounds = array<i64: 256, 32>}, {pipeline_mode = #tpu.pipeline_mode<synchronous>, transform_indices = @transform_1, window_bounds = array<i64: 32, 72>}, {pipeline_mode = #tpu.pipeline_mode<synchronous>, transform_indices = @transform_2, window_bounds = array<i64: 1, 72>}, {transform_indices = @transform_3, window_bounds = array<i64: 256, 72>}]} {
    %c0 = arith.constant 0 : index
    %c0_0 = arith.constant 0 : index
    %0 = vector.load %arg3[%c0, %c0_0] : memref<1x72xf32, #tpu.memory_space<vmem>>, vector<1x72xf32>
    %c0_1 = arith.constant 0 : index
    %c0_2 = arith.constant 0 : index
    %1 = vector.load %arg1[%c0_1, %c0_2] : memref<256x32xf32, #tpu.memory_space<vmem>>, vector<256x32xf32>
    %c0_3 = arith.constant 0 : index
    %c0_4 = arith.constant 0 : index
    %2 = vector.load %arg2[%c0_3, %c0_4] : memref<32x72xf32, #tpu.memory_space<vmem>>, vector<32x72xf32>
    %cst = arith.constant dense<0.000000e+00> : vector<256x72xf32>
    %3 = tpu.matmul %1, %2, %cst {dimension_numbers = #tpu.dot_dimension_numbers<[1], [0], [0], [1], [0, 0, 1, 1], [], []>} : vector<256x32xf32>, vector<32x72xf32>, vector<256x72xf32> -> vector<256x72xf32>
    %4 = vector.broadcast %0 : vector<1x72xf32> to vector<256x72xf32>
    %5 = arith.addf %4, %3 : vector<256x72xf32>
    %6 = tpu.iota {dimensions = array<i32: 1>} : vector<256x72xi32>
    %c0_i32 = arith.constant 0 : i32
    %7 = vector.broadcast %c0_i32 : i32 to vector<256x72xi32>
    %8 = arith.cmpi sge, %6, %7 : vector<256x72xi32>
    %c32_i32 = arith.constant 32 : i32
    %9 = vector.broadcast %c32_i32 : i32 to vector<256x72xi32>
    %10 = arith.cmpi slt, %6, %9 : vector<256x72xi32>
    %11 = arith.andi %8, %10 : vector<256x72xi1>
    %cst_5 = arith.constant 0.000000e+00 : f32
    %12 = vector.broadcast %cst_5 : f32 to vector<256x72xf32>
    %13 = arith.cmpf ogt, %5, %12 : vector<256x72xf32>
    %cst_6 = arith.constant 1.000000e+00 : f32
    %14 = vector.broadcast %cst_6 : f32 to vector<256x72xf32>
    %15 = arith.addf %5, %14 : vector<256x72xf32>
    %cst_7 = arith.constant 0.000000e+00 : f32
    %16 = vector.broadcast %cst_7 : f32 to vector<256x72xf32>
    %17 = arith.minimumf %5, %16 : vector<256x72xf32>
    %18 = math.exp %17 : vector<256x72xf32>
    %19 = arith.select %13, %15, %18 : vector<256x72xi1>, vector<256x72xf32>
    %20 = arith.select %11, %19, %5 : vector<256x72xi1>, vector<256x72xf32>
    %c64_i32 = arith.constant 64 : i32
    %21 = vector.broadcast %c64_i32 : i32 to vector<256x72xi32>
    %22 = arith.cmpi sge, %6, %21 : vector<256x72xi32>
    %c72_i32 = arith.constant 72 : i32
    %23 = vector.broadcast %c72_i32 : i32 to vector<256x72xi32>
    %24 = arith.cmpi slt, %6, %23 : vector<256x72xi32>
    %25 = arith.andi %22, %24 : vector<256x72xi1>
    %cst_8 = arith.constant 0.000000e+00 : f32
    %26 = vector.broadcast %cst_8 : f32 to vector<256x72xf32>
    %27 = arith.maximumf %20, %26 : vector<256x72xf32>
    %28 = arith.select %25, %27, %20 : vector<256x72xi1>, vector<256x72xf32>
    %c0_9 = arith.constant 0 : index
    %c0_10 = arith.constant 0 : index
    %29 = vector.load %arg4[%c0_9, %c0_10] : memref<256x72xf32, #tpu.memory_space<vmem>>, vector<256x72xf32>
    tpu.vector_store %arg4[%c0_9, %c0_10], %28 {strides = array<i32>} : memref<256x72xf32, #tpu.memory_space<vmem>>, vector<256x72xf32>,
    return
  }
  func.func @transform_0(%arg0: i32) -> (i32, i32) {
    %c0_i32 = arith.constant 0 : i32
    %c0_i32_0 = arith.constant 0 : i32
    return %arg0, %c0_i32 : i32, i32
  }
  func.func @transform_1(%arg0: i32) -> (i32, i32) {
    %c0_i32 = arith.constant 0 : i32
    %c0_i32_0 = arith.constant 0 : i32
    %c0_i32_1 = arith.constant 0 : i32
    return %c0_i32, %c0_i32_0 : i32, i32
  }
  func.func @transform_2(%arg0: i32) -> (i32, i32) {
    %c0_i32 = arith.constant 0 : i32
    %c0_i32_0 = arith.constant 0 : i32
    %c0_i32_1 = arith.constant 0 : i32
    return %c0_i32, %c0_i32_0 : i32, i32
  }
  func.func @transform_3(%arg0: i32) -> (i32, i32) {
    %c0_i32 = arith.constant 0 : i32
    %c0_i32_0 = arith.constant 0 : i32
    return %arg0, %c0_i32 : i32, i32
  }
}

module attributes {stable_mosaic.version = 11 : i64} {
  func.func @_fused_linear_kernel(%arg0: i32, %arg1: memref<64x32xf32, #tpu.memory_space<vmem>>, %arg2: memref<32x32xf32, #tpu.memory_space<vmem>>, %arg3: memref<1x32xf32, #tpu.memory_space<vmem>>, %arg4: memref<64x32xf32, #tpu.memory_space<vmem>>) attributes {dimension_semantics = [#tpu.dimension_semantics<parallel>], iteration_bounds = array<i64: 2>, scalar_prefetch = 0 : i64, scratch_operands = 0 : i64, tpu.core_type = #tpu.core_type<tc>, window_params = [{transform_indices = @transform_0, window_bounds = array<i64: 64, 32>}, {pipeline_mode = #tpu.pipeline_mode<synchronous>, transform_indices = @transform_1, window_bounds = array<i64: 32, 32>}, {pipeline_mode = #tpu.pipeline_mode<synchronous>, transform_indices = @transform_2, window_bounds = array<i64: 1, 32>}, {transform_indices = @transform_3, window_bounds = array<i64: 64, 32>}]} {
    %c0 = arith.constant 0 : index
    %c0_0 = arith.constant 0 : index
    %0 = vector.load %arg3[%c0, %c0_0] : memref<1x32xf32, #tpu.memory_space<vmem>>, vector<1x32xf32>
    %c0_1 = arith.constant 0 : index
    %c0_2 = arith.constant 0 : index
    %1 = vector.load %arg1[%c0_1, %c0_2] : memref<64x32xf32, #tpu.memory_space<vmem>>, vector<64x32xf32>
    %c0_3 = arith.constant 0 : index
    %c0_4 = arith.constant 0 : index
    %2 = vector.load %arg2[%c0_3, %c0_4] : memref<32x32xf32, #tpu.memory_space<vmem>>, vector<32x32xf32>
    %cst = arith.constant dense<0.000000e+00> : vector<64x32xf32>
    %3 = tpu.matmul %1, %2, %cst {dimension_numbers = #tpu.dot_dimension_numbers<[1], [0], [0], [1], [0, 0, 1, 1], [], []>} : vector<64x32xf32>, vector<32x32xf32>, vector<64x32xf32> -> vector<64x32xf32>
    %4 = vector.broadcast %0 : vector<1x32xf32> to vector<64x32xf32>
    %5 = arith.addf %4, %3 : vector<64x32xf32>
    %cst_5 = arith.constant 0.000000e+00 : f32
    %6 = vector.broadcast %cst_5 : f32 to vector<64x32xf32>
    %7 = arith.cmpf ogt, %5, %6 : vector<64x32xf32>
    %cst_6 = arith.constant 1.000000e+00 : f32
    %8 = vector.broadcast %cst_6 : f32 to vector<64x32xf32>
    %9 = arith.addf %5, %8 : vector<64x32xf32>
    %cst_7 = arith.constant 0.000000e+00 : f32
    %10 = vector.broadcast %cst_7 : f32 to vector<64x32xf32>
    %11 = arith.minimumf %5, %10 : vector<64x32xf32>
    %12 = math.exp %11 : vector<64x32xf32>
    %13 = arith.select %7, %9, %12 : vector<64x32xi1>, vector<64x32xf32>
    %c0_8 = arith.constant 0 : index
    %c0_9 = arith.constant 0 : index
    %14 = vector.load %arg4[%c0_8, %c0_9] : memref<64x32xf32, #tpu.memory_space<vmem>>, vector<64x32xf32>
    tpu.vector_store %arg4[%c0_8, %c0_9], %13 {strides = array<i32>} : memref<64x32xf32, #tpu.memory_space<vmem>>, vector<64x32xf32>,
    return
  }
  func.func @transform_0(%arg0: i32) -> (i32, i32) {
    %c0_i32 = arith.constant 0 : i32
    %c0_i32_0 = arith.constant 0 : i32
    return %arg0, %c0_i32 : i32, i32
  }
  func.func @transform_1(%arg0: i32) -> (i32, i32) {
    %c0_i32 = arith.constant 0 : i32
    %c0_i32_0 = arith.constant 0 : i32
    %c0_i32_1 = arith.constant 0 : i32
    return %c0_i32, %c0_i32_0 : i32, i32
  }
  func.func @transform_2(%arg0: i32) -> (i32, i32) {
    %c0_i32 = arith.constant 0 : i32
    %c0_i32_0 = arith.constant 0 : i32
    %c0_i32_1 = arith.constant 0 : i32
    return %c0_i32, %c0_i32_0 : i32, i32
  }
  func.func @transform_3(%arg0: i32) -> (i32, i32) {
    %c0_i32 = arith.constant 0 : i32
    %c0_i32_0 = arith.constant 0 : i32
    return %arg0, %c0_i32 : i32, i32
  }
}

module attributes {stable_mosaic.version = 11 : i64} {
  func.func @_linattn_kernel(%arg0: i32, %arg1: memref<1x32x256xf32, #tpu.memory_space<vmem>>, %arg2: memref<1x2x32x64xf32, #tpu.memory_space<vmem>>, %arg3: memref<2x32x256xf32, #tpu.memory_space<vmem>>, %arg4: memref<2x32x64xf32, #tpu.memory_space<vmem>>, %arg5: memref<2x32x32xf32, #tpu.memory_space<vmem>>, %arg6: memref<1x32x256xf32, #tpu.memory_space<vmem>>) attributes {dimension_semantics = [#tpu.dimension_semantics<parallel>], iteration_bounds = array<i64: 2>, scalar_prefetch = 0 : i64, scratch_operands = 0 : i64, tpu.core_type = #tpu.core_type<tc>, window_params = [{transform_indices = @transform_0, window_bounds = array<i64: 1, 32, 256>}, {transform_indices = @transform_1, window_bounds = array<i64: 1, 2, 32, 64>}, {pipeline_mode = #tpu.pipeline_mode<synchronous>, transform_indices = @transform_2, window_bounds = array<i64: 2, 32, 256>}, {pipeline_mode = #tpu.pipeline_mode<synchronous>, transform_indices = @transform_3, window_bounds = array<i64: 2, 32, 64>}, {pipeline_mode = #tpu.pipeline_mode<synchronous>, transform_indices = @transform_4, window_bounds = array<i64: 2, 32, 32>}, {transform_indices = @transform_5, window_bounds = array<i64: 1, 32, 256>}]} {
    %c0 = arith.constant 0 : index
    %c0_0 = arith.constant 0 : index
    %c0_1 = arith.constant 0 : index
    %0 = vector.load %arg1[%c0, %c0_0, %c0_1] : memref<1x32x256xf32, #tpu.memory_space<vmem>>, vector<1x32x256xf32>
    %1 = vector.shape_cast %0 : vector<1x32x256xf32> to vector<32x256xf32>
    %c0_2 = arith.constant 0 : index
    %c0_3 = arith.constant 0 : index
    %c0_4 = arith.constant 0 : index
    %c0_5 = arith.constant 0 : index
    %2 = vector.load %arg2[%c0_2, %c0_3, %c0_4, %c0_5] : memref<1x2x32x64xf32, #tpu.memory_space<vmem>>, vector<1x1x32x64xf32>
    %3 = vector.shape_cast %2 : vector<1x1x32x64xf32> to vector<32x64xf32>
    %c0_6 = arith.constant 0 : index
    %c1 = arith.constant 1 : index
    %c0_7 = arith.constant 0 : index
    %c0_8 = arith.constant 0 : index
    %4 = vector.load %arg2[%c0_6, %c1, %c0_7, %c0_8] : memref<1x2x32x64xf32, #tpu.memory_space<vmem>>, vector<1x1x32x64xf32>
    %5 = vector.shape_cast %4 : vector<1x1x32x64xf32> to vector<32x64xf32>
    %c0_9 = arith.constant 0 : index
    %c0_10 = arith.constant 0 : index
    %c0_11 = arith.constant 0 : index
    %6 = vector.load %arg5[%c0_9, %c0_10, %c0_11] : memref<2x32x32xf32, #tpu.memory_space<vmem>>, vector<1x32x32xf32>
    %7 = vector.shape_cast %6 : vector<1x32x32xf32> to vector<32x32xf32>
    %c1_12 = arith.constant 1 : index
    %c0_13 = arith.constant 0 : index
    %c0_14 = arith.constant 0 : index
    %8 = vector.load %arg5[%c1_12, %c0_13, %c0_14] : memref<2x32x32xf32, #tpu.memory_space<vmem>>, vector<1x32x32xf32>
    %9 = vector.shape_cast %8 : vector<1x32x32xf32> to vector<32x32xf32>
    %c0_15 = arith.constant 0 : index
    %c0_16 = arith.constant 0 : index
    %c0_17 = arith.constant 0 : index
    %10 = vector.load %arg3[%c0_15, %c0_16, %c0_17] : memref<2x32x256xf32, #tpu.memory_space<vmem>>, vector<1x32x256xf32>
    %11 = vector.shape_cast %10 : vector<1x32x256xf32> to vector<32x256xf32>
    %12 = arith.mulf %11, %1 : vector<32x256xf32>
    %c1_18 = arith.constant 1 : index
    %c0_19 = arith.constant 0 : index
    %c0_20 = arith.constant 0 : index
    %13 = vector.load %arg3[%c1_18, %c0_19, %c0_20] : memref<2x32x256xf32, #tpu.memory_space<vmem>>, vector<1x32x256xf32>
    %14 = vector.shape_cast %13 : vector<1x32x256xf32> to vector<32x256xf32>
    %cst = arith.constant dense<0.000000e+00> : vector<32x256xf32>
    %15 = tpu.matmul %7, %1, %cst {dimension_numbers = #tpu.dot_dimension_numbers<[1], [0], [0], [1], [0, 0, 1, 1], [], []>} : vector<32x32xf32>, vector<32x256xf32>, vector<32x256xf32> -> vector<32x256xf32>
    %16 = arith.mulf %14, %15 : vector<32x256xf32>
    %17 = arith.addf %12, %16 : vector<32x256xf32>
    %c0_21 = arith.constant 0 : index
    %c0_22 = arith.constant 0 : index
    %c0_23 = arith.constant 0 : index
    %18 = vector.load %arg4[%c0_21, %c0_22, %c0_23] : memref<2x32x64xf32, #tpu.memory_space<vmem>>, vector<1x32x64xf32>
    %19 = vector.shape_cast %18 : vector<1x32x64xf32> to vector<32x64xf32>
    %20 = arith.mulf %19, %3 : vector<32x64xf32>
    %c1_24 = arith.constant 1 : index
    %c0_25 = arith.constant 0 : index
    %c0_26 = arith.constant 0 : index
    %21 = vector.load %arg4[%c1_24, %c0_25, %c0_26] : memref<2x32x64xf32, #tpu.memory_space<vmem>>, vector<1x32x64xf32>
    %22 = vector.shape_cast %21 : vector<1x32x64xf32> to vector<32x64xf32>
    %cst_27 = arith.constant dense<0.000000e+00> : vector<32x64xf32>
    %23 = tpu.matmul %7, %3, %cst_27 {dimension_numbers = #tpu.dot_dimension_numbers<[1], [0], [0], [1], [0, 0, 1, 1], [], []>} : vector<32x32xf32>, vector<32x64xf32>, vector<32x64xf32> -> vector<32x64xf32>
    %24 = arith.mulf %22, %23 : vector<32x64xf32>
    %25 = arith.addf %20, %24 : vector<32x64xf32>
    %cst_28 = arith.constant dense<0.000000e+00> : vector<32xf32>
    %26 = vector.multi_reduction <add>, %3, %cst_28 [1] : vector<32x64xf32> to vector<32xf32>
    %27 = vector.shape_cast %26 : vector<32xf32> to vector<32x1xf32>
    %cst_29 = arith.constant 6.400000e+01 : f32
    %28 = vector.broadcast %cst_29 : f32 to vector<32x1xf32>
    %29 = arith.divf %27, %28 : vector<32x1xf32>
    %30 = vector.broadcast %29 : vector<32x1xf32> to vector<32x256xf32>
    %31 = arith.mulf %1, %30 : vector<32x256xf32>
    %cst_30 = arith.constant dense<0.000000e+00> : vector<32x256xf32>
    %32 = tpu.matmul %9, %31, %cst_30 {dimension_numbers = #tpu.dot_dimension_numbers<[1], [0], [0], [1], [0, 0, 1, 1], [], []>} : vector<32x32xf32>, vector<32x256xf32>, vector<32x256xf32> -> vector<32x256xf32>
    %cst_31 = arith.constant 9.99999997E-7 : f32
    %33 = vector.broadcast %cst_31 : f32 to vector<32x256xf32>
    %34 = arith.addf %32, %33 : vector<32x256xf32>
    %35 = tpu.reciprocal %34 {approx = true} : vector<32x256xf32> -> vector<32x256xf32>
    %cst_32 = arith.constant dense<0.000000e+00> : vector<32x32xf32>
    %36 = tpu.matmul %5, %25, %cst_32 {dimension_numbers = #tpu.dot_dimension_numbers<[1], [1], [0], [0], [0, 0, 1, 0], [], []>} : vector<32x64xf32>, vector<32x64xf32>, vector<32x32xf32> -> vector<32x32xf32>
    %37 = arith.mulf %36, %9 : vector<32x32xf32>
    %cst_33 = arith.constant dense<0.000000e+00> : vector<32x256xf32>
    %38 = tpu.matmul %37, %17, %cst_33 {dimension_numbers = #tpu.dot_dimension_numbers<[1], [0], [0], [1], [0, 0, 1, 1], [], []>} : vector<32x32xf32>, vector<32x256xf32>, vector<32x256xf32> -> vector<32x256xf32>
    %cst_34 = arith.constant 3.906250e-03 : f32
    %39 = vector.broadcast %cst_34 : f32 to vector<32x256xf32>
    %40 = arith.mulf %39, %35 : vector<32x256xf32>
    %41 = arith.mulf %38, %40 : vector<32x256xf32>
    %c0_35 = arith.constant 0 : index
    %c0_36 = arith.constant 0 : index
    %c0_37 = arith.constant 0 : index
    %42 = vector.load %arg6[%c0_35, %c0_36, %c0_37] : memref<1x32x256xf32, #tpu.memory_space<vmem>>, vector<1x32x256xf32>
    %43 = vector.shape_cast %42 : vector<1x32x256xf32> to vector<32x256xf32>
    %44 = vector.shape_cast %41 : vector<32x256xf32> to vector<1x32x256xf32>
    tpu.vector_store %arg6[%c0_35, %c0_36, %c0_37], %44 {strides = array<i32>} : memref<1x32x256xf32, #tpu.memory_space<vmem>>, vector<1x32x256xf32>,
    return
  }
  func.func @transform_0(%arg0: i32) -> (i32, i32, i32) {
    %c0_i32 = arith.constant 0 : i32
    %c0_i32_0 = arith.constant 0 : i32
    %c0_i32_1 = arith.constant 0 : i32
    return %arg0, %c0_i32, %c0_i32_0 : i32, i32, i32
  }
  func.func @transform_1(%arg0: i32) -> (i32, i32, i32, i32) {
    %c0_i32 = arith.constant 0 : i32
    %c0_i32_0 = arith.constant 0 : i32
    %c0_i32_1 = arith.constant 0 : i32
    %c0_i32_2 = arith.constant 0 : i32
    return %arg0, %c0_i32, %c0_i32_0, %c0_i32_1 : i32, i32, i32, i32
  }
  func.func @transform_2(%arg0: i32) -> (i32, i32, i32) {
    %c0_i32 = arith.constant 0 : i32
    %c0_i32_0 = arith.constant 0 : i32
    %c0_i32_1 = arith.constant 0 : i32
    %c0_i32_2 = arith.constant 0 : i32
    return %c0_i32, %c0_i32_0, %c0_i32_1 : i32, i32, i32
  }
  func.func @transform_3(%arg0: i32) -> (i32, i32, i32) {
    %c0_i32 = arith.constant 0 : i32
    %c0_i32_0 = arith.constant 0 : i32
    %c0_i32_1 = arith.constant 0 : i32
    %c0_i32_2 = arith.constant 0 : i32
    return %c0_i32, %c0_i32_0, %c0_i32_1 : i32, i32, i32
  }
  func.func @transform_4(%arg0: i32) -> (i32, i32, i32) {
    %c0_i32 = arith.constant 0 : i32
    %c0_i32_0 = arith.constant 0 : i32
    %c0_i32_1 = arith.constant 0 : i32
    %c0_i32_2 = arith.constant 0 : i32
    return %c0_i32, %c0_i32_0, %c0_i32_1 : i32, i32, i32
  }
  func.func @transform_5(%arg0: i32) -> (i32, i32, i32) {
    %c0_i32 = arith.constant 0 : i32
    %c0_i32_0 = arith.constant 0 : i32
    %c0_i32_1 = arith.constant 0 : i32
    return %arg0, %c0_i32, %c0_i32_0 : i32, i32, i32
  }
}

module attributes {stable_mosaic.version = 11 : i64} {
  func.func @_fused_linear_kernel(%arg0: i32, %arg1: memref<256x32xf32, #tpu.memory_space<vmem>>, %arg2: memref<256x8xf32, #tpu.memory_space<vmem>>, %arg3: memref<32x32xf32, #tpu.memory_space<vmem>>, %arg4: memref<8x32xf32, #tpu.memory_space<vmem>>, %arg5: memref<1x32xf32, #tpu.memory_space<vmem>>, %arg6: memref<256x32xf32, #tpu.memory_space<vmem>>) attributes {dimension_semantics = [#tpu.dimension_semantics<parallel>], iteration_bounds = array<i64: 2>, scalar_prefetch = 0 : i64, scratch_operands = 0 : i64, tpu.core_type = #tpu.core_type<tc>, window_params = [{transform_indices = @transform_0, window_bounds = array<i64: 256, 32>}, {transform_indices = @transform_1, window_bounds = array<i64: 256, 8>}, {pipeline_mode = #tpu.pipeline_mode<synchronous>, transform_indices = @transform_2, window_bounds = array<i64: 32, 32>}, {pipeline_mode = #tpu.pipeline_mode<synchronous>, transform_indices = @transform_3, window_bounds = array<i64: 8, 32>}, {pipeline_mode = #tpu.pipeline_mode<synchronous>, transform_indices = @transform_4, window_bounds = array<i64: 1, 32>}, {transform_indices = @transform_5, window_bounds = array<i64: 256, 32>}]} {
    %c0 = arith.constant 0 : index
    %c0_0 = arith.constant 0 : index
    %0 = vector.load %arg5[%c0, %c0_0] : memref<1x32xf32, #tpu.memory_space<vmem>>, vector<1x32xf32>
    %c0_1 = arith.constant 0 : index
    %c0_2 = arith.constant 0 : index
    %1 = vector.load %arg1[%c0_1, %c0_2] : memref<256x32xf32, #tpu.memory_space<vmem>>, vector<256x32xf32>
    %c0_3 = arith.constant 0 : index
    %c0_4 = arith.constant 0 : index
    %2 = vector.load %arg3[%c0_3, %c0_4] : memref<32x32xf32, #tpu.memory_space<vmem>>, vector<32x32xf32>
    %cst = arith.constant dense<0.000000e+00> : vector<256x32xf32>
    %3 = tpu.matmul %1, %2, %cst {dimension_numbers = #tpu.dot_dimension_numbers<[1], [0], [0], [1], [0, 0, 1, 1], [], []>} : vector<256x32xf32>, vector<32x32xf32>, vector<256x32xf32> -> vector<256x32xf32>
    %4 = vector.broadcast %0 : vector<1x32xf32> to vector<256x32xf32>
    %5 = arith.addf %4, %3 : vector<256x32xf32>
    %c0_5 = arith.constant 0 : index
    %c0_6 = arith.constant 0 : index
    %6 = vector.load %arg2[%c0_5, %c0_6] : memref<256x8xf32, #tpu.memory_space<vmem>>, vector<256x8xf32>
    %c0_7 = arith.constant 0 : index
    %c0_8 = arith.constant 0 : index
    %7 = vector.load %arg4[%c0_7, %c0_8] : memref<8x32xf32, #tpu.memory_space<vmem>>, vector<8x32xf32>
    %cst_9 = arith.constant dense<0.000000e+00> : vector<256x32xf32>
    %8 = tpu.matmul %6, %7, %cst_9 {dimension_numbers = #tpu.dot_dimension_numbers<[1], [0], [0], [1], [0, 0, 1, 1], [], []>} : vector<256x8xf32>, vector<8x32xf32>, vector<256x32xf32> -> vector<256x32xf32>
    %9 = arith.addf %5, %8 : vector<256x32xf32>
    %c0_10 = arith.constant 0 : index
    %c0_11 = arith.constant 0 : index
    %10 = vector.load %arg6[%c0_10, %c0_11] : memref<256x32xf32, #tpu.memory_space<vmem>>, vector<256x32xf32>
    tpu.vector_store %arg6[%c0_10, %c0_11], %9 {strides = array<i32>} : memref<256x32xf32, #tpu.memory_space<vmem>>, vector<256x32xf32>,
    return
  }
  func.func @transform_0(%arg0: i32) -> (i32, i32) {
    %c0_i32 = arith.constant 0 : i32
    %c0_i32_0 = arith.constant 0 : i32
    return %arg0, %c0_i32 : i32, i32
  }
  func.func @transform_1(%arg0: i32) -> (i32, i32) {
    %c0_i32 = arith.constant 0 : i32
    %c0_i32_0 = arith.constant 0 : i32
    return %arg0, %c0_i32 : i32, i32
  }
  func.func @transform_2(%arg0: i32) -> (i32, i32) {
    %c0_i32 = arith.constant 0 : i32
    %c0_i32_0 = arith.constant 0 : i32
    %c0_i32_1 = arith.constant 0 : i32
    return %c0_i32, %c0_i32_0 : i32, i32
  }
  func.func @transform_3(%arg0: i32) -> (i32, i32) {
    %c0_i32 = arith.constant 0 : i32
    %c0_i32_0 = arith.constant 0 : i32
    %c0_i32_1 = arith.constant 0 : i32
    return %c0_i32, %c0_i32_0 : i32, i32
  }
  func.func @transform_4(%arg0: i32) -> (i32, i32) {
    %c0_i32 = arith.constant 0 : i32
    %c0_i32_0 = arith.constant 0 : i32
    %c0_i32_1 = arith.constant 0 : i32
    return %c0_i32, %c0_i32_0 : i32, i32
  }
  func.func @transform_5(%arg0: i32) -> (i32, i32) {
    %c0_i32 = arith.constant 0 : i32
    %c0_i32_0 = arith.constant 0 : i32
    return %arg0, %c0_i32 : i32, i32
  }
}

</mosaic_0001>

<bundles_post_ra>
// kernel: linear_attention_forward.4
= control target key start
LH: loop header
LB: loop body
LE: loop exit
PB: predicated region body
PF: predicated region fallthrough
CT: control target
= control target key end

     0   :  { %s1204_s12 = smov 0   ;;  %s1855_s0 = inlined_call_operand.vmem [shape: f32[512,32], index: 0, kind: input, shape index: {}]   ;;  %s1856_s1 = inlined_call_operand.vmem [shape: f32[32,72], index: 1, kind: input, shape index: {}]   ;;  %s1857_s2 = inlined_call_operand.vmem [shape: f32[1,72], index: 2, kind: input, shape index: {}]   ;;  %s1858_s3 = inlined_call_operand.vmem [shape: f32[512,72], index: 3, kind: output, shape index: {}]  }
   0x1 LB: > { %s956_s13 = sadd.s32 4294967295, %s1182_s12   ;;  %p960_p0 = scmp.ge.s32.totalorder %s1182_s12, 1  ;;  %s1182_s12 = sphi %s1204_s12, %s13_s12  }
   0x2   : > { %p138_p1 = scmp.lt.s32.totalorder %s1182_s12, 3 }
   0x4   : > { %p139_p2 = pnand %p960_p0, %p138_p1 }
   0x5   : > { %v207_v0 = vld [vmem:[%s1856_s1] sm:$0xff] (!%p139_p2)  ;;  %v208_v1 = vld [vmem:[%s1856_s1 + $0x8] sm:$0xff] (!%p139_p2)  ;;  %v209_v2 = vld [vmem:[%s1856_s1 + $0x10] sm:$0xff] (!%p139_p2)  ;;  %s961_s20 = sshll.u32 (!%p139_p2), %s956_s13, 5  ;;  %vm211_vm0 = vcmask (!%p139_p2), 261120   ;;  %v571_v40 = vlaneseq (!%p139_p2)  ;;  %vm867_vm7 = vcmask (!%p139_p2), 588800  }
   0x6   : > { %142 = sbr.rel (%p139_p2) target bundleno = 320 (0x140), region = 32  ;;  %v1092_v3 = vpack.c.bf16 (!%p139_p2), %v208_v1, %v207_v0  ;;  %v210_v4 = vld [vmem:[%s1856_s1 + $0x18] sm:$0xff] (!%p139_p2)  ;;  %p163_p3 = scmp.lt.s32.totalorder (!%p139_p2), %s961_s20, 63  ;;  %v1301_v38 = vld [vmem:[%s1857_s2] ss:$0 sm:$0xff] (!%p139_p2) }
   0x7   : > { %v1096_v5 = vpack.c.bf16 (!%p139_p2), %v210_v4, %v209_v2  ;;  %v1316_v49 = vand.u32 (!%p139_p2), 127, %v571_v40 }
   0x8   : > { %1093 = vmatprep.subr.bf16.mxu0 (!%p139_p2), %v1092_v3  ;;  %1100 = vmatprep.subr.bf16.mxu1 (!%p139_p2), %v1092_v3 }
   0x9   : > { %1095 = vmatpush3.bf16.msra.mxu0 (!%p139_p2), %v1092_v3  ;;  %1102 = vmatpush3.bf16.msra.mxu1 (!%p139_p2), %v1092_v3  ;;  %vm574_vm1 = vcmp.lt.s32.totalorder (!%p139_p2), %v1316_v49, 32  ;;  %vm800_vm2 = vcmp.ge.s32.totalorder (!%p139_p2), %v1316_v49, 64  ;;  %vm801_vm3 = vcmp.lt.s32.totalorder (!%p139_p2), %v1316_v49, 72 }
   0xa   : > { %1097 = vmatprep.subr.bf16.mxu0 (!%p139_p2), %v1096_v5  ;;  %1101 = vmatprep.subr.bf16.mxu1 (!%p139_p2), %v1096_v5  ;;  %vm1407_vm13 = vmand (!%p139_p2), %vm800_vm2, %vm801_vm3 }
   0xd   : > { %s1862_s20 = smov (!%p163_p3, %s961_s20), 63  ;;  %1099 = vmatpush3.bf16.msra.mxu0 %v1096_v5  ;;  %1103 = vmatpush3.bf16.msra.mxu1 %v1096_v5 }
   0xe   : > { %s962_s23 = sshll.u32 %s1862_s20, 3 }
   0xf   : > { %s1232_s26 = scalar_lea.vmem %s1855_s0, %s962_s23  ;;  %s1418_s4 = scalar_lea.vmem %s1858_s3, %s962_s23 }
  0x10   : > { %v175_v6 = vld [vmem:[%s1232_s26] sm:$0xff]  ;;  %v176_v8 = vld [vmem:[%s1232_s26 + $0x8] sm:$0xff]  ;;  %v177_v10 = vld [vmem:[%s1232_s26 + $0x10] sm:$0xff] }
  0x11   : > { %v191_v7 = vld [vmem:[%s1232_s26 + $0x80] sm:$0xff]  ;;  %v192_v9 = vld [vmem:[%s1232_s26 + $0x88] sm:$0xff]  ;;  %1044 = vmatprep.mubr.msk.f32.mxu0 %vm211_vm0, %v175_v6  ;;  %v193_v11 = vld [vmem:[%s1232_s26 + $0x90] sm:$0xff] }
  0x12   : > { %1068 = vmatprep.mubr.msk.f32.mxu1 %vm211_vm0, %v191_v7  ;;  %1045 = vmatmul.mubr.msk.f32.vlgmr.msra.gmra.mrb[0].mxu0 %vm211_vm0, %v176_v8  ;;  %v178_v12 = vld [vmem:[%s1232_s26 + $0x18] sm:$0xff]  ;;  %v179_v14 = vld [vmem:[%s1232_s26 + $0x20] sm:$0xff]  ;;  %v180_v16 = vld [vmem:[%s1232_s26 + $0x28] sm:$0xff] }
  0x13   : > { %1069 = vmatmul.mubr.msk.f32.vlgmr.msra.gmra.mrb[0].mxu1 %vm211_vm0, %v192_v9  ;;  %1047 = vmatprep.mubr.msk.f32.mxu0 %vm211_vm0, %v177_v10  ;;  %v194_v13 = vld [vmem:[%s1232_s26 + $0x98] sm:$0xff]  ;;  %v195_v15 = vld [vmem:[%s1232_s26 + $0xa0] sm:$0xff]  ;;  %v196_v17 = vld [vmem:[%s1232_s26 + $0xa8] sm:$0xff] }
  0x14   : > { %1071 = vmatprep.mubr.msk.f32.mxu1 %vm211_vm0, %v193_v11  ;;  %v181_v18 = vld [vmem:[%s1232_s26 + $0x30] sm:$0xff]  ;;  %v182_v20 = vld [vmem:[%s1232_s26 + $0x38] sm:$0xff]  ;;  %v183_v22 = vld [vmem:[%s1232_s26 + $0x40] sm:$0xff] }
  0x15   : > { %v197_v19 = vld [vmem:[%s1232_s26 + $0xb0] sm:$0xff]  ;;  %v198_v21 = vld [vmem:[%s1232_s26 + $0xb8] sm:$0xff]  ;;  %v199_v23 = vld [vmem:[%s1232_s26 + $0xc0] sm:$0xff] }
  0x16   : > { %1048 = vmatmul.mubr.msk.f32.gmra.mrb[2].mxu0 %vm211_vm0, %v178_v12  ;;  %v184_v24 = vld [vmem:[%s1232_s26 + $0x48] sm:$0xff]  ;;  %v185_v26 = vld [vmem:[%s1232_s26 + $0x50] sm:$0xff]  ;;  %v186_v28 = vld [vmem:[%s1232_s26 + $0x58] sm:$0xff] }
  0x17   : > { %1072 = vmatmul.mubr.msk.f32.gmra.mrb[2].mxu1 %vm211_vm0, %v194_v13  ;;  %1050 = vmatprep.mubr.msk.f32.mxu0 %vm211_vm0, %v179_v14  ;;  %v200_v25 = vld [vmem:[%s1232_s26 + $0xc8] sm:$0xff]  ;;  %v201_v27 = vld [vmem:[%s1232_s26 + $0xd0] sm:$0xff]  ;;  %v202_v29 = vld [vmem:[%s1232_s26 + $0xd8] sm:$0xff] }
  0x18   : > { %1074 = vmatprep.mubr.msk.f32.mxu1 %vm211_vm0, %v195_v15  ;;  %v187_v30 = vld [vmem:[%s1232_s26 + $0x60] sm:$0xff]  ;;  %v188_v32 = vld [vmem:[%s1232_s26 + $0x68] sm:$0xff]  ;;  %v189_v34 = vld [vmem:[%s1232_s26 + $0x70] sm:$0xff] }
  0x19   : > { %v203_v31 = vld [vmem:[%s1232_s26 + $0xe0] sm:$0xff]  ;;  %v204_v33 = vld [vmem:[%s1232_s26 + $0xe8] sm:$0xff]  ;;  %v205_v35 = vld [vmem:[%s1232_s26 + $0xf0] sm:$0xff] }
  0x1a   : > { %1051 = vmatmul.mubr.msk.f32.gmra.mrb[4].mxu0 %vm211_vm0, %v180_v16  ;;  %v190_v36 = vld [vmem:[%s1232_s26 + $0x78] sm:$0xff] }
  0x1b   : > { %1075 = vmatmul.mubr.msk.f32.gmra.mrb[4].mxu1 %vm211_vm0, %v196_v17  ;;  %1053 = vmatprep.mubr.msk.f32.mxu0 %vm211_vm0, %v181_v18  ;;  %v206_v37 = vld [vmem:[%s1232_s26 + $0xf8] sm:$0xff] }
  0x1c   : > { %1077 = vmatprep.mubr.msk.f32.mxu1 %vm211_vm0, %v197_v19 }
  0x1e   : > { %1054 = vmatmul.mubr.msk.f32.gmra.mrb[6].mxu0 %vm211_vm0, %v182_v20 }
  0x1f   : > { %1078 = vmatmul.mubr.msk.f32.gmra.mrb[6].mxu1 %vm211_vm0, %v198_v21  ;;  %1056 = vmatprep.mubr.msk.f32.mxu0 %vm211_vm0, %v183_v22 }
  0x20   : > { %1080 = vmatprep.mubr.msk.f32.mxu1 %vm211_vm0, %v199_v23 }
  0x22   : > { %1057 = vmatmul.mubr.msk.f32.gmra.mrb[8].mxu0 %vm211_vm0, %v184_v24 }
  0x23   : > { %1081 = vmatmul.mubr.msk.f32.gmra.mrb[8].mxu1 %vm211_vm0, %v200_v25  ;;  %1059 = vmatprep.mubr.msk.f32.mxu0 %vm211_vm0, %v185_v26 }
  0x24   : > { %1083 = vmatprep.mubr.msk.f32.mxu1 %vm211_vm0, %v201_v27 }
  0x26   : > { %1060 = vmatmul.mubr.msk.f32.gmra.mrb[10].mxu0 %vm211_vm0, %v186_v28 }
  0x27   : > { %1084 = vmatmul.mubr.msk.f32.gmra.mrb[10].mxu1 %vm211_vm0, %v202_v29  ;;  %1062 = vmatprep.mubr.msk.f32.mxu0 %vm211_vm0, %v187_v30 }
  0x28   : > { %1086 = vmatprep.mubr.msk.f32.mxu1 %vm211_vm0, %v203_v31 }
  0x2a   : > { %1063 = vmatmul.mubr.msk.f32.gmra.mrb[12].mxu0 %vm211_vm0, %v188_v32 }
  0x2b   : > { %1087 = vmatmul.mubr.msk.f32.gmra.mrb[12].mxu1 %vm211_vm0, %v204_v33  ;;  %1065 = vmatprep.mubr.msk.f32.mxu0 %vm211_vm0, %v189_v34 }
  0x2c   : > { %1089 = vmatprep.mubr.msk.f32.mxu1 %vm211_vm0, %v205_v35 }
  0x2e   : > { %1066 = vmatmul.mubr.msk.f32.gmra.mrb[14].mxu0 %vm211_vm0, %v190_v36 }
  0x2f   : > { %1090 = vmatmul.mubr.msk.f32.gmra.mrb[14].mxu1 %vm211_vm0, %v206_v37 }
  0xe5   : > { %v1046_v39 = vpop.f32.mrb[0].mxu0 }
  0xe6   : > { %v1070_v41 = vpop.f32.mrb[0].mxu1  ;;  %v1304_v42 = vadd.f32 %v1046_v39, %v1301_v38  ;;  %v374_v44 = vpop.f32.mrb[1].mxu0 }
  0xe7   : > { %v1307_v43 = vadd.f32 %v1070_v41, %v1301_v38  ;;  %v454_v45 = vpop.f32.mrb[1].mxu1  ;;  %v1310_v46 = vadd.f32 %v1301_v38, %v374_v44 }
  0xe8   : > { %v1313_v47 = vadd.f32 %v1301_v38, %v454_v45  ;;  %v641_v48 = vmin.f32 %v1304_v42, 0.0  ;;  %vm577_vm4 = vcmp.gt.f32.partialorder %v1304_v42, 0.0  ;;  %v609_v3 = vadd.f32 1.0, %v1304_v42 }
  0xe9   : > { %v657_v50 = vmin.f32 %v1307_v43, 0.0  ;;  %v1049_v51 = vpop.f32.mrb[2].mxu0  ;;  %v640_v54 = vmin.f32 %v1310_v46, 0.0  ;;  %vm593_vm5 = vcmp.gt.f32.partialorder %v1307_v43, 0.0  ;;  %v625_v7 = vadd.f32 1.0, %v1307_v43 }
  0xea   : > { %v1073_v52 = vpop.f32.mrb[2].mxu1  ;;  %v674_v53 = vmul.f32 1.442695, %v641_v48  ;;  %v384_v55 = vpop.f32.mrb[3].mxu0  ;;  %v656_v57 = vmin.f32 %v1313_v47, 0.0  ;;  %v1322_v58 = vadd.f32 %v1049_v51, %v1301_v38  ;;  %vm576_vm6 = vcmp.gt.f32.partialorder %v1310_v46, 0.0 }
  0xeb   : > { %v706_v56 = vmul.f32 1.442695, %v657_v50  ;;  %v1325_v59 = vadd.f32 %v1073_v52, %v1301_v38  ;;  %v464_v60 = vpop.f32.mrb[3].mxu1  ;;  %v672_v61 = vmul.f32 1.442695, %v640_v54  ;;  %v1328_v62 = vadd.f32 %v1301_v38, %v384_v55 }
  0xec   : > { %1112 = vpow2.f32 %v674_v53  ;;  %v704_v63 = vmul.f32 1.442695, %v656_v57  ;;  %v1334_v0 = vadd.f32 %v1301_v38, %v464_v60  ;;  %v643_v4 = vmin.f32 %v1322_v58, 0.0 }
  0xed   : > { %1114 = vpow2.f32 %v706_v56  ;;  %v1052_v1 = vpop.f32.mrb[4].mxu0  ;;  %v659_v8 = vmin.f32 %v1325_v59, 0.0  ;;  %v608_v9 = vadd.f32 1.0, %v1310_v46  ;;  %v642_v11 = vmin.f32 %v1328_v62, 0.0 }
  0xee   : > { %v1076_v2 = vpop.f32.mrb[4].mxu1  ;;  %1116 = vpow2.f32 %v672_v61  ;;  %v394_v5 = vpop.f32.mrb[5].mxu0  ;;  %v678_v10 = vmul.f32 1.442695, %v643_v4  ;;  %v658_v13 = vmin.f32 %v1334_v0, 0.0  ;;  %v1347_v14 = vadd.f32 %v1052_v1, %v1301_v38 }
  0xef   : > { %v474_v6 = vpop.f32.mrb[5].mxu1  ;;  %1118 = vpow2.f32 %v704_v63  ;;  %v710_v12 = vmul.f32 1.442695, %v659_v8  ;;  %v1350_v15 = vadd.f32 %v1076_v2, %v1301_v38  ;;  %vm592_vm8 = vcmp.gt.f32.partialorder %v1313_v47, 0.0 }
  0xf0   : > { %1120 = vpow2.f32 %v678_v10  ;;  %v676_v18 = vmul.f32 1.442695, %v642_v11  ;;  %v1356_v19 = vadd.f32 %v1301_v38, %v394_v5  ;;  %v624_v22 = vadd.f32 1.0, %v1313_v47 }
  0xf1   : > { %v1055_v16 = vpop.f32.mrb[6].mxu0  ;;  %1122 = vpow2.f32 %v710_v12  ;;  %v708_v23 = vmul.f32 1.442695, %v658_v13  ;;  %v1364_v24 = vadd.f32 %v1301_v38, %v474_v6  ;;  %vm579_vm9 = vcmp.gt.f32.partialorder %v1322_v58, 0.0 }
  0xf2   : > { %v1352_v17 = vpop.f32.mrb[6].mxu1  ;;  %v1358_v20 = vpop.f32.mrb[7].mxu0  ;;  %v611_v25 = vadd.f32 1.0, %v1322_v58  ;;  %1124 = vpow2.f32 %v676_v18  ;;  %v645_v26 = vmin.f32 %v1347_v14, 0.0  ;;  %vm595_vm10 = vcmp.gt.f32.partialorder %v1325_v59, 0.0 }
  0xf3   : > { %v1360_v21 = vpop.f32.mrb[7].mxu1  ;;  %v1371_v27 = vadd.f32 1.0, %v1325_v59  ;;  %v1374_v28 = vadd.f32 1.0, %v1328_v62  ;;  %1126 = vpow2.f32 %v708_v23  ;;  %v661_v29 = vmin.f32 %v1350_v15, 0.0 }
  0xf4   : > { %vm578_vm11 = vcmp.gt.f32.partialorder %v1328_v62, 0.0  ;;  %v1383_v33 = vadd.f32 1.0, %v1334_v0  ;;  %v1386_v34 = vadd.f32 1.0, %v1347_v14  ;;  %v682_v35 = vmul.f32 1.442695, %v645_v26 }
  0xf5   : > { %v1377_v30 = vpop.f32.mrb[8].mxu0  ;;  %v644_v36 = vmin.f32 %v1356_v19, 0.0  ;;  %vm594_vm12 = vcmp.gt.f32.partialorder %v1334_v0, 0.0  ;;  %v714_v41 = vmul.f32 1.442695, %v661_v29  ;;  %v660_v44 = vmin.f32 %v1364_v24, 0.0 }
  0xf6   : > { %v1379_v31 = vpop.f32.mrb[8].mxu1  ;;  %v1113_v32 = vpop.eup %1112  ;;  %v1396_v45 = vadd.f32 %v1055_v16, %v1301_v38  ;;  %1128 = vpow2.f32 %v682_v35  ;;  %vm581_vm14 = vcmp.gt.f32.partialorder %v1347_v14, 0.0  ;;  %vm597_vm15 = vcmp.gt.f32.partialorder %v1350_v15, 0.0 }
  0xf7   : > { %v1389_v37 = vpop.f32.mrb[9].mxu0  ;;  %v1115_v39 = vpop.eup %1114  ;;  %v737_v40 = vsel %vm577_vm4, %v609_v3, %v1113_v32  ;;  %v680_v54 = vmul.f32 1.442695, %v644_v36  ;;  %1130 = vpow2.f32 %v714_v41  ;;  %v629_v10 = vadd.f32 1.0, %v1350_v15 }
  0xf8   : > { %v1398_v48 = vpop.f32.mrb[9].mxu1  ;;  %v1117_v50 = vpop.eup %1116  ;;  %v769_v51 = vsel %vm574_vm1, %v737_v40, %v1304_v42  ;;  %v753_v53 = vsel %vm593_vm5, %v625_v7, %v1115_v39  ;;  %v647_v13 = vmin.f32 %v1396_v45, 0.0  ;;  %v1473_v29 = vadd.f32 %v1352_v17, %v1301_v38 }
  0xf9   : > { %v1119_v55 = vpop.eup %1118  ;;  %v804_v42 = vmax.f32 %v769_v51, 0.0  ;;  %v785_v56 = vsel %vm574_vm1, %v753_v53, %v1307_v43  ;;  %v736_v57 = vsel %vm576_vm6, %v608_v9, %v1117_v50  ;;  %v1425_v60 = vpop.f32.mrb[10].mxu0  ;;  %1132 = vpow2.f32 %v680_v54 }
  0xfa   : > { %v1427_v61 = vpop.f32.mrb[10].mxu1  ;;  %v820_v63 = vmax.f32 %v785_v56, 0.0  ;;  %v768_v1 = vsel %vm574_vm1, %v736_v57, %v1310_v46  ;;  %v752_v2 = vsel %vm592_vm8, %v624_v22, %v1119_v55  ;;  %v1435_v43 = vpop.f32.mrb[11].mxu0  ;;  %v712_v46 = vmul.f32 1.442695, %v660_v44 }
  0xfb   : > { %v1437_v3 = vpop.f32.mrb[11].mxu1  ;;  %v836_v4 = vsel %vm1407_vm13, %v804_v42, %v769_v51  ;;  %v803_v5 = vmax.f32 %v768_v1, 0.0  ;;  %v784_v6 = vsel %vm574_vm1, %v752_v2, %v1313_v47  ;;  %v1121_v7 = vpop.eup %1120  ;;  %v686_v40 = vmul.f32 1.442695, %v647_v13 }
  0xfc   : > { %869 = vst.msk [vmem:[%s1418_s4 + $0x8] sm:$0xff] %vm867_vm7, %v836_v4  ;;  %v852_v8 = vsel %vm1407_vm13, %v820_v63, %v785_v56  ;;  %v819_v9 = vmax.f32 %v784_v6, 0.0  ;;  %v1123_v11 = vpop.eup %1122  ;;  %v739_v12 = vsel %vm579_vm9, %v611_v25, %v1121_v7  ;;  %1134 = vpow2.f32 %v712_v46 }
  0xfd   : > { %885 = vst.msk [vmem:[%s1418_s4 + $0x88] sm:$0xff] %vm867_vm7, %v852_v8  ;;  %v835_v47 = vsel %vm1407_vm13, %v803_v5, %v768_v1  ;;  %v1457_v16 = vpop.f32.mrb[12].mxu0  ;;  %v1125_v22 = vpop.eup %1124  ;;  %v771_v26 = vsel %vm574_vm1, %v739_v12, %v1322_v58  ;;  %v755_v25 = vsel %vm595_vm10, %v1371_v27, %v1123_v11  ;;  %vm580_vm0 = vcmp.gt.f32.partialorder %v1356_v19, 0.0 }
  0xfe   : > { %v1459_v18 = vpop.f32.mrb[12].mxu1  ;;  %868 = vst.msk [vmem:[%s1418_s4] sm:$0xff] %vm867_vm7, %v835_v47  ;;  %v851_v23 = vsel %vm1407_vm13, %v819_v9, %v784_v6  ;;  %v1475_v32 = vpop.f32.mrb[13].mxu0  ;;  %v806_v39 = vmax.f32 %v771_v26, 0.0  ;;  %v787_v58 = vsel %vm574_vm1, %v755_v25, %v1325_v59  ;;  %v738_v27 = vsel %vm578_vm11, %v1374_v28, %v1125_v22 }
  0xff   : > { %v1477_v35 = vpop.f32.mrb[13].mxu1  ;;  %v1127_v36 = vpop.eup %1126  ;;  %884 = vst.msk [vmem:[%s1418_s4 + $0x80] sm:$0xff] %vm867_vm7, %v851_v23  ;;  %v822_v17 = vmax.f32 %v787_v58, 0.0  ;;  %v770_v41 = vsel %vm574_vm1, %v738_v27, %v1328_v62  ;;  %1136 = vpow2.f32 %v686_v40  ;;  %v612_v55 = vadd.f32 1.0, %v1356_v19 }
 0x100   : > { %v754_v44 = vsel %vm594_vm12, %v1383_v33, %v1127_v36  ;;  %v838_v59 = vsel %vm1407_vm13, %v806_v39, %v771_v26  ;;  %v805_v50 = vmax.f32 %v770_v41, 0.0  ;;  %v1129_v62 = vpop.eup %1128  ;;  %v663_v42 = vmin.f32 %v1473_v29, 0.0 }
 0x101   : > { %v786_v28 = vsel %vm574_vm1, %v754_v44, %v1334_v0  ;;  %v1499_v51 = vpop.f32.mrb[14].mxu0  ;;  %871 = vst.msk [vmem:[%s1418_s4 + $0x18] sm:$0xff] %vm867_vm7, %v838_v59  ;;  %v854_v33 = vsel %vm1407_vm13, %v822_v17, %v787_v58  ;;  %v1131_v57 = vpop.eup %1130  ;;  %v741_v1 = vsel %vm581_vm14, %v1386_v34, %v1129_v62  ;;  %v1522_v2 = vadd.f32 %v1301_v38, %v1358_v20 }
 0x102   : > { %v1501_v53 = vpop.f32.mrb[14].mxu1  ;;  %v821_v54 = vmax.f32 %v786_v28, 0.0  ;;  %v1509_v56 = vpop.f32.mrb[15].mxu0  ;;  %887 = vst.msk [vmem:[%s1418_s4 + $0x98] sm:$0xff] %vm867_vm7, %v854_v33  ;;  %v837_v63 = vsel %vm1407_vm13, %v805_v50, %v770_v41  ;;  %v1526_v4 = vadd.f32 %v1301_v38, %v1360_v21  ;;  %v773_v46 = vsel %vm574_vm1, %v741_v1, %v1347_v14 }
 0x103   : > { %v1511_v0 = vpop.f32.mrb[15].mxu1  ;;  %v1133_v5 = vpop.eup %1132  ;;  %870 = vst.msk [vmem:[%s1418_s4 + $0x10] sm:$0xff] %vm867_vm7, %v837_v63  ;;  %v757_v34 = vsel %vm597_vm15, %v629_v10, %v1131_v57  ;;  %v718_v20 = vmul.f32 1.442695, %v663_v42  ;;  %v808_v7 = vmax.f32 %v773_v46, 0.0  ;;  %v628_v11 = vadd.f32 1.0, %v1364_v24 }
 0x104   : > { %v853_v6 = vsel %vm1407_vm13, %v821_v54, %v786_v28  ;;  %v789_v21 = vsel %vm574_vm1, %v757_v34, %v1350_v15  ;;  %v740_v8 = vsel %vm580_vm0, %v612_v55, %v1133_v5  ;;  %vm596_vm2 = vcmp.gt.f32.partialorder %v1364_v24, 0.0 }
 0x105   : > { %886 = vst.msk [vmem:[%s1418_s4 + $0x90] sm:$0xff] %vm867_vm7, %v853_v6  ;;  %v824_v9 = vmax.f32 %v789_v21, 0.0  ;;  %v772_v14 = vsel %vm574_vm1, %v740_v8, %v1356_v19  ;;  %1138 = vpow2.f32 %v718_v20  ;;  %v840_v47 = vsel %vm1407_vm13, %v808_v7, %v773_v46 }
 0x106   : > { %v1135_v10 = vpop.eup %1134  ;;  %v807_v12 = vmax.f32 %v772_v14, 0.0  ;;  %v646_v15 = vmin.f32 %v1522_v2, 0.0  ;;  %873 = vst.msk [vmem:[%s1418_s4 + $0x28] sm:$0xff] %vm867_vm7, %v840_v47  ;;  %v615_v19 = vadd.f32 1.0, %v1396_v45  ;;  %v662_v23 = vmin.f32 %v1526_v4, 0.0 }
 0x107   : > { %v856_v13 = vsel %vm1407_vm13, %v824_v9, %v789_v21  ;;  %v756_v22 = vsel %vm596_vm2, %v628_v11, %v1135_v10  ;;  %v1567_v39 = vadd.f32 %v1377_v30, %v1301_v38  ;;  %v1573_v40 = vadd.f32 %v1379_v31, %v1301_v38 }
 0x108   : > { %889 = vst.msk [vmem:[%s1418_s4 + $0xa8] sm:$0xff] %vm867_vm7, %v856_v13  ;;  %v839_v26 = vsel %vm1407_vm13, %v807_v12, %v772_v14  ;;  %v788_v25 = vsel %vm574_vm1, %v756_v22, %v1364_v24  ;;  %v684_v36 = vmul.f32 1.442695, %v646_v15  ;;  %v716_v27 = vmul.f32 1.442695, %v662_v23 }
 0x109   : > { %872 = vst.msk [vmem:[%s1418_s4 + $0x20] sm:$0xff] %vm867_vm7, %v839_v26  ;;  %v823_v58 = vmax.f32 %v788_v25, 0.0  ;;  %v1577_v17 = vadd.f32 %v1301_v38, %v1389_v37  ;;  %v1137_v41 = vpop.eup %1136  ;;  %vm583_vm3 = vcmp.gt.f32.partialorder %v1396_v45, 0.0  ;;  %v649_v24 = vmin.f32 %v1567_v39, 0.0 }
 0x10a   : > { %1140 = vpow2.f32 %v684_v36  ;;  %v743_v44 = vsel %vm583_vm3, %v615_v19, %v1137_v41  ;;  %vm599_vm4 = vcmp.gt.f32.partialorder %v1473_v29, 0.0  ;;  %v631_v37 = vadd.f32 1.0, %v1473_v29 }
 0x10b   : > { %v855_v30 = vsel %vm1407_vm13, %v823_v58, %v788_v25  ;;  %1142 = vpow2.f32 %v716_v27  ;;  %v775_v31 = vsel %vm574_vm1, %v743_v44, %v1396_v45  ;;  %v690_v59 = vmul.f32 1.442695, %v649_v24 }
 0x10c   : > { %888 = vst.msk [vmem:[%s1418_s4 + $0xa0] sm:$0xff] %vm867_vm7, %v855_v30  ;;  %v665_v50 = vmin.f32 %v1573_v40, 0.0  ;;  %v810_v28 = vmax.f32 %v775_v31, 0.0  ;;  %vm582_vm5 = vcmp.gt.f32.partialorder %v1522_v2, 0.0  ;;  %v614_v62 = vadd.f32 1.0, %v1522_v2 }
 0x10d   : > { %v648_v33 = vmin.f32 %v1577_v17, 0.0  ;;  %1144 = vpow2.f32 %v690_v59  ;;  %v1596_v55 = vadd.f32 %v1301_v38, %v1398_v48  ;;  %v1600_v45 = vadd.f32 %v1425_v60, %v1301_v38 }
 0x10e   : > { %v722_v54 = vmul.f32 1.442695, %v665_v50  ;;  %v842_v57 = vsel %vm1407_vm13, %v810_v28, %v775_v31  ;;  %vm598_vm6 = vcmp.gt.f32.partialorder %v1526_v4, 0.0  ;;  %v1607_v1 = vadd.f32 %v1427_v61, %v1301_v38 }
 0x10f   : > { %v1139_v42 = vpop.eup %1138  ;;  %v688_v63 = vmul.f32 1.442695, %v648_v33  ;;  %875 = vst.msk [vmem:[%s1418_s4 + $0x38] sm:$0xff] %vm867_vm7, %v842_v57  ;;  %v630_v5 = vadd.f32 1.0, %v1526_v4  ;;  %v1616_v60 = vadd.f32 %v1301_v38, %v1435_v43  ;;  %vm585_vm8 = vcmp.gt.f32.partialorder %v1567_v39, 0.0 }
 0x110   : > { %v759_v48 = vsel %vm599_vm4, %v631_v37, %v1139_v42  ;;  %1146 = vpow2.f32 %v722_v54  ;;  %v664_v61 = vmin.f32 %v1596_v55, 0.0  ;;  %v617_v34 = vadd.f32 1.0, %v1567_v39 }
 0x111   : > { %v791_v6 = vsel %vm574_vm1, %v759_v48, %v1473_v29  ;;  %1148 = vpow2.f32 %v688_v63  ;;  %vm601_vm9 = vcmp.gt.f32.partialorder %v1573_v40, 0.0  ;;  %v651_v20 = vmin.f32 %v1600_v45, 0.0 }
 0x112   : > { %v826_v46 = vmax.f32 %v791_v6, 0.0  ;;  %v633_v43 = vadd.f32 1.0, %v1573_v40  ;;  %vm584_vm10 = vcmp.gt.f32.partialorder %v1577_v17, 0.0  ;;  %v720_v7 = vmul.f32 1.442695, %v664_v61 }
 0x113   : > { %v667_v29 = vmin.f32 %v1607_v1, 0.0  ;;  %v616_v9 = vadd.f32 1.0, %v1577_v17  ;;  %v694_v14 = vmul.f32 1.442695, %v651_v20  ;;  %v650_v11 = vmin.f32 %v1616_v60, 0.0 }
 0x114   : > { %v1141_v21 = vpop.eup %1140  ;;  %v858_v8 = vsel %vm1407_vm13, %v826_v46, %v791_v6  ;;  %1150 = vpow2.f32 %v720_v7  ;;  %v1639_v15 = vadd.f32 %v1301_v38, %v1437_v3  ;;  %vm600_vm11 = vcmp.gt.f32.partialorder %v1596_v55, 0.0 }
 0x115   : > { %v1143_v10 = vpop.eup %1142  ;;  %891 = vst.msk [vmem:[%s1418_s4 + $0xb8] sm:$0xff] %vm867_vm7, %v858_v8  ;;  %v742_v47 = vsel %vm582_vm5, %v614_v62, %v1141_v21  ;;  %v726_v12 = vmul.f32 1.442695, %v667_v29  ;;  %1152 = vpow2.f32 %v694_v14  ;;  %v692_v19 = vmul.f32 1.442695, %v650_v11 }
 0x116   : > { %v774_v13 = vsel %vm574_vm1, %v742_v47, %v1522_v2  ;;  %v758_v22 = vsel %vm598_vm6, %v630_v5, %v1143_v10  ;;  %v632_v36 = vadd.f32 1.0, %v1596_v55  ;;  %v666_v2 = vmin.f32 %v1639_v15, 0.0 }
 0x117   : > { %v809_v23 = vmax.f32 %v774_v13, 0.0  ;;  %v790_v26 = vsel %vm574_vm1, %v758_v22, %v1526_v4  ;;  %1154 = vpow2.f32 %v726_v12  ;;  %v1145_v3 = vpop.eup %1144  ;;  %vm587_vm12 = vcmp.gt.f32.partialorder %v1600_v45, 0.0 }
 0x118   : > { %v825_v25 = vmax.f32 %v790_v26, 0.0  ;;  %1156 = vpow2.f32 %v692_v19  ;;  %v745_v27 = vsel %vm585_vm8, %v617_v34, %v1145_v3  ;;  %v1659_v4 = vadd.f32 %v1457_v16, %v1301_v38 }
 0x119   : > { %v841_v58 = vsel %vm1407_vm13, %v809_v23, %v774_v13  ;;  %v777_v30 = vsel %vm574_vm1, %v745_v27, %v1567_v39  ;;  %v724_v44 = vmul.f32 1.442695, %v666_v2  ;;  %v1670_v31 = vadd.f32 %v1459_v18, %v1301_v38 }
 0x11a   : > { %v1147_v41 = vpop.eup %1146  ;;  %874 = vst.msk [vmem:[%s1418_s4 + $0x30] sm:$0xff] %vm867_vm7, %v841_v58  ;;  %v857_v24 = vsel %vm1407_vm13, %v825_v25, %v790_v26  ;;  %v812_v16 = vmax.f32 %v777_v30, 0.0  ;;  %v619_v50 = vadd.f32 1.0, %v1600_v45  ;;  %v1679_v28 = vadd.f32 %v1301_v38, %v1475_v32 }
 0x11b   : > { %v1149_v37 = vpop.eup %1148  ;;  %890 = vst.msk [vmem:[%s1418_s4 + $0xb0] sm:$0xff] %vm867_vm7, %v857_v24  ;;  %v761_v59 = vsel %vm601_vm9, %v633_v43, %v1147_v41  ;;  %1158 = vpow2.f32 %v724_v44  ;;  %v653_v62 = vmin.f32 %v1659_v4, 0.0  ;;  %vm603_vm14 = vcmp.gt.f32.partialorder %v1607_v1, 0.0 }
 0x11c   : > { %v793_v39 = vsel %vm574_vm1, %v761_v59, %v1573_v40  ;;  %v744_v18 = vsel %vm584_vm10, %v616_v9, %v1149_v37  ;;  %v844_v33 = vsel %vm1407_vm13, %v812_v16, %v777_v30  ;;  %v635_v42 = vadd.f32 1.0, %v1607_v1 }
 0x11d   : > { %v828_v54 = vmax.f32 %v793_v39, 0.0  ;;  %v776_v32 = vsel %vm574_vm1, %v744_v18, %v1577_v17  ;;  %877 = vst.msk [vmem:[%s1418_s4 + $0x48] sm:$0xff] %vm867_vm7, %v844_v33  ;;  %v698_v57 = vmul.f32 1.442695, %v653_v62  ;;  %v669_v63 = vmin.f32 %v1670_v31, 0.0 }
 0x11e   : > { %v811_v40 = vmax.f32 %v776_v32, 0.0  ;;  %v1151_v48 = vpop.eup %1150  ;;  %vm586_vm15 = vcmp.gt.f32.partialorder %v1616_v60, 0.0  ;;  %v618_v6 = vadd.f32 1.0, %v1616_v60  ;;  %v652_v17 = vmin.f32 %v1679_v28, 0.0 }
 0x11f   : > { %v860_v5 = vsel %vm1407_vm13, %v828_v54, %v793_v39  ;;  %v1153_v61 = vpop.eup %1152  ;;  %v760_v34 = vsel %vm600_vm11, %v632_v36, %v1151_v48  ;;  %1160 = vpow2.f32 %v698_v57  ;;  %v730_v20 = vmul.f32 1.442695, %v669_v63 }
 0x120   : > { %893 = vst.msk [vmem:[%s1418_s4 + $0xc8] sm:$0xff] %vm867_vm7, %v860_v5  ;;  %v843_v46 = vsel %vm1407_vm13, %v811_v40, %v776_v32  ;;  %v792_v7 = vsel %vm574_vm1, %v760_v34, %v1596_v55  ;;  %v747_v29 = vsel %vm587_vm12, %v619_v50, %v1153_v61  ;;  %v696_v21 = vmul.f32 1.442695, %v652_v17 }
 0x121   : > { %v1155_v43 = vpop.eup %1154  ;;  %876 = vst.msk [vmem:[%s1418_s4 + $0x40] sm:$0xff] %vm867_vm7, %v843_v46  ;;  %v1717_v8 = vadd.f32 %v1301_v38, %v1477_v35  ;;  %v827_v14 = vmax.f32 %v792_v7, 0.0  ;;  %v779_v11 = vsel %vm574_vm1, %v747_v29, %v1600_v45  ;;  %1162 = vpow2.f32 %v730_v20 }
 0x122   : > { %v1157_v9 = vpop.eup %1156  ;;  %v763_v10 = vsel %vm603_vm14, %v635_v42, %v1155_v43  ;;  %v814_v55 = vmax.f32 %v779_v11, 0.0  ;;  %1164 = vpow2.f32 %v696_v21  ;;  %v634_v19 = vadd.f32 1.0, %v1639_v15 }
 0x123   : > { %v795_v47 = vsel %vm574_vm1, %v763_v10, %v1607_v1  ;;  %v746_v35 = vsel %vm586_vm15, %v618_v6, %v1157_v9  ;;  %v859_v12 = vsel %vm1407_vm13, %v827_v14, %v792_v7  ;;  %v668_v23 = vmin.f32 %v1717_v8, 0.0 }
 0x124   : > { %v830_v13 = vmax.f32 %v795_v47, 0.0  ;;  %v778_v45 = vsel %vm574_vm1, %v746_v35, %v1616_v60  ;;  %892 = vst.msk [vmem:[%s1418_s4 + $0xc0] sm:$0xff] %vm867_vm7, %v859_v12  ;;  %v846_v22 = vsel %vm1407_vm13, %v814_v55, %v779_v11  ;;  %vm602_vm0 = vcmp.gt.f32.partialorder %v1639_v15, 0.0 }
 0x125   : > { %v813_v1 = vmax.f32 %v778_v45, 0.0  ;;  %v1159_v26 = vpop.eup %1158  ;;  %879 = vst.msk [vmem:[%s1418_s4 + $0x58] sm:$0xff] %vm867_vm7, %v846_v22  ;;  %v1747_v60 = vadd.f32 %v1499_v51, %v1301_v38  ;;  %v1751_v25 = vadd.f32 %v1501_v53, %v1301_v38  ;;  %v728_v58 = vmul.f32 1.442695, %v668_v23 }
 0x126   : > { %v862_v3 = vsel %vm1407_vm13, %v830_v13, %v795_v47  ;;  %v762_v2 = vsel %vm602_vm0, %v634_v19, %v1159_v26  ;;  %v1759_v27 = vadd.f32 %v1301_v38, %v1509_v56  ;;  %vm589_vm2 = vcmp.gt.f32.partialorder %v1659_v4, 0.0 }
 0x127   : > { %895 = vst.msk [vmem:[%s1418_s4 + $0xd8] sm:$0xff] %vm867_vm7, %v862_v3  ;;  %v845_v36 = vsel %vm1407_vm13, %v813_v1, %v778_v45  ;;  %v794_v51 = vsel %vm574_vm1, %v762_v2, %v1639_v15  ;;  %v655_v53 = vmin.f32 %v1747_v60, 0.0  ;;  %v621_v24 = vadd.f32 1.0, %v1659_v4 }
 0x128   : > { %878 = vst.msk [vmem:[%s1418_s4 + $0x50] sm:$0xff] %vm867_vm7, %v845_v36  ;;  %v829_v41 = vmax.f32 %v794_v51, 0.0  ;;  %1166 = vpow2.f32 %v728_v58  ;;  %v1771_v30 = vadd.f32 %v1301_v38, %v1511_v0  ;;  %vm605_vm3 = vcmp.gt.f32.partialorder %v1670_v31, 0.0 }
 0x129   : > { %v1161_v56 = vpop.eup %1160  ;;  %v637_v44 = vadd.f32 1.0, %v1670_v31  ;;  %v702_v37 = vmul.f32 1.442695, %v655_v53  ;;  %v671_v15 = vmin.f32 %v1751_v25, 0.0  ;;  %vm588_vm4 = vcmp.gt.f32.partialorder %v1679_v28, 0.0 }
 0x12a   : > { %v861_v16 = vsel %vm1407_vm13, %v829_v41, %v794_v51  ;;  %v749_v59 = vsel %vm589_vm2, %v621_v24, %v1161_v56  ;;  %v654_v50 = vmin.f32 %v1759_v27, 0.0  ;;  %v620_v0 = vadd.f32 1.0, %v1679_v28 }
 0x12b   : > { %v1163_v39 = vpop.eup %1162  ;;  %894 = vst.msk [vmem:[%s1418_s4 + $0xd0] sm:$0xff] %vm867_vm7, %v861_v16  ;;  %v781_v38 = vsel %vm574_vm1, %v749_v59, %v1659_v4  ;;  %1168 = vpow2.f32 %v702_v37  ;;  %v734_v18 = vmul.f32 1.442695, %v671_v15  ;;  %v670_v40 = vmin.f32 %v1771_v30, 0.0 }
 0x12c   : > { %v1165_v62 = vpop.eup %1164  ;;  %v816_v33 = vmax.f32 %v781_v38, 0.0  ;;  %v765_v54 = vsel %vm605_vm3, %v637_v44, %v1163_v39  ;;  %v700_v32 = vmul.f32 1.442695, %v654_v50  ;;  %v636_v61 = vadd.f32 1.0, %v1717_v8 }
 0x12d   : > { %v797_v42 = vsel %vm574_vm1, %v765_v54, %v1670_v31  ;;  %v748_v4 = vsel %vm588_vm4, %v620_v0, %v1165_v62  ;;  %1170 = vpow2.f32 %v734_v18  ;;  %v732_v6 = vmul.f32 1.442695, %v670_v40 }
 0x12e   : > { %v848_v57 = vsel %vm1407_vm13, %v816_v33, %v781_v38  ;;  %v832_v63 = vmax.f32 %v797_v42, 0.0  ;;  %v780_v48 = vsel %vm574_vm1, %v748_v4, %v1679_v28  ;;  %1172 = vpow2.f32 %v700_v32 }
 0x12f   : > { %881 = vst.msk [vmem:[%s1418_s4 + $0x68] sm:$0xff] %vm867_vm7, %v848_v57  ;;  %v815_v5 = vmax.f32 %v780_v48, 0.0  ;;  %1174 = vpow2.f32 %v732_v6  ;;  %vm604_vm5 = vcmp.gt.f32.partialorder %v1717_v8, 0.0  ;;  %v623_v20 = vadd.f32 1.0, %v1747_v60 }
 0x130   : > { %v864_v17 = vsel %vm1407_vm13, %v832_v63, %v797_v42  ;;  %vm591_vm6 = vcmp.gt.f32.partialorder %v1747_v60, 0.0  ;;  %v639_v21 = vadd.f32 1.0, %v1751_v25  ;;  %vm607_vm8 = vcmp.gt.f32.partialorder %v1751_v25, 0.0 }
 0x131   : > { %897 = vst.msk [vmem:[%s1418_s4 + $0xe8] sm:$0xff] %vm867_vm7, %v864_v17  ;;  %v847_v31 = vsel %vm1407_vm13, %v815_v5, %v780_v48  ;;  %vm590_vm9 = vcmp.gt.f32.partialorder %v1759_v27, 0.0  ;;  %v638_v1 = vadd.f32 1.0, %v1771_v30  ;;  %vm606_vm10 = vcmp.gt.f32.partialorder %v1771_v30, 0.0 }
 0x132   : > { %v1167_v46 = vpop.eup %1166  ;;  %880 = vst.msk [vmem:[%s1418_s4 + $0x60] sm:$0xff] %vm867_vm7, %v847_v31 }
 0x133   : > { %v764_v28 = vsel %vm604_vm5, %v636_v61, %v1167_v46 }
 0x134   : > { %v796_v34 = vsel %vm574_vm1, %v764_v28, %v1717_v8  ;;  %v622_v8 = vadd.f32 1.0, %v1759_v27 }
 0x135   : > { %v1169_v43 = vpop.eup %1168  ;;  %v831_v7 = vmax.f32 %v796_v34, 0.0 }
 0x136   : > { %v751_v29 = vsel %vm591_vm6, %v623_v20, %v1169_v43 }
 0x137   : > { %v1171_v9 = vpop.eup %1170  ;;  %v863_v14 = vsel %vm1407_vm13, %v831_v7, %v796_v34  ;;  %v783_v11 = vsel %vm574_vm1, %v751_v29, %v1747_v60 }
 0x138   : > { %v1173_v10 = vpop.eup %1172  ;;  %896 = vst.msk [vmem:[%s1418_s4 + $0xe0] sm:$0xff] %vm867_vm7, %v863_v14  ;;  %v818_v55 = vmax.f32 %v783_v11, 0.0  ;;  %v767_v47 = vsel %vm607_vm8, %v639_v21, %v1171_v9 }
 0x139   : > { %v799_v35 = vsel %vm574_vm1, %v767_v47, %v1751_v25  ;;  %v750_v12 = vsel %vm590_vm9, %v622_v8, %v1173_v10  ;;  %v1175_v19 = vpop.eup %1174 }
 0x13a   : > { %v850_v13 = vsel %vm1407_vm13, %v818_v55, %v783_v11  ;;  %v834_v45 = vmax.f32 %v799_v35, 0.0  ;;  %v782_v22 = vsel %vm574_vm1, %v750_v12, %v1759_v27  ;;  %v766_v3 = vsel %vm606_vm10, %v638_v1, %v1175_v19 }
 0x13b   : > { %883 = vst.msk [vmem:[%s1418_s4 + $0x78] sm:$0xff] %vm867_vm7, %v850_v13  ;;  %v817_v23 = vmax.f32 %v782_v22, 0.0  ;;  %v798_v25 = vsel %vm574_vm1, %v766_v3, %v1771_v30 }
 0x13c   : > { %v866_v26 = vsel %vm1407_vm13, %v834_v45, %v799_v35  ;;  %v833_v36 = vmax.f32 %v798_v25, 0.0 }
 0x13d   : > { %899 = vst.msk [vmem:[%s1418_s4 + $0xf8] sm:$0xff] %vm867_vm7, %v866_v26  ;;  %v849_v60 = vsel %vm1407_vm13, %v817_v23, %v782_v22 }
 0x13e   : > { %882 = vst.msk [vmem:[%s1418_s4 + $0x70] sm:$0xff] %vm867_vm7, %v849_v60  ;;  %v865_v2 = vsel %vm1407_vm13, %v833_v36, %v798_v25 }
 0x13f   : > { %898 = vst.msk [vmem:[%s1418_s4 + $0xf0] sm:$0xff] %vm867_vm7, %v865_v2 }
 0x140 PF: > { %s13_s12 = sadd.s32 1, %s1182_s12  }
 0x141   : > { %p10_p4 = scmp.ge.s32.totalorder %s13_s12, 4  }
 0x143   :  { %12 = sbr.rel (!%p10_p4) target bundleno = 1 (0x1), region = 62 }

// kernel: linear_attention_forward.5
= control target key start
LH: loop header
LB: loop body
LE: loop exit
PB: predicated region body
PF: predicated region fallthrough
CT: control target
= control target key end

     0   :  { %s559_s12 = smov 0   ;;  %s624_s0 = inlined_call_operand.vmem [shape: f32[128,32], index: 0, kind: input, shape index: {}]   ;;  %s625_s1 = inlined_call_operand.vmem [shape: f32[32,32], index: 1, kind: input, shape index: {}]   ;;  %s626_s2 = inlined_call_operand.vmem [shape: f32[1,32], index: 2, kind: input, shape index: {}]   ;;  %s627_s3 = inlined_call_operand.vmem [shape: f32[128,32], index: 3, kind: output, shape index: {}]  }
   0x1 LB: > { %s443_s13 = sadd.s32 4294967295, %s537_s12   ;;  %p447_p0 = scmp.ge.s32.totalorder %s537_s12, 1  ;;  %s537_s12 = sphi %s559_s12, %s13_s12  }
   0x2   : > { %p138_p1 = scmp.lt.s32.totalorder %s537_s12, 3 }
   0x4   : > { %p139_p2 = pnand %p447_p0, %p138_p1 }
   0x5   : > { %v183_v0 = vld [vmem:[%s625_s1] sm:$0xff] (!%p139_p2)  ;;  %v184_v1 = vld [vmem:[%s625_s1 + $0x8] sm:$0xff] (!%p139_p2)  ;;  %v185_v2 = vld [vmem:[%s625_s1 + $0x10] sm:$0xff] (!%p139_p2)  ;;  %s448_s20 = sshll.u32 (!%p139_p2), %s443_s13, 3  ;;  %vm187_vm0 = vcmask (!%p139_p2), 261120  }
   0x6   : > { %142 = sbr.rel (%p139_p2) target bundleno = 256 (0x100), region = 32  ;;  %v495_v3 = vpack.c.bf16 (!%p139_p2), %v184_v1, %v183_v0  ;;  %v186_v4 = vld [vmem:[%s625_s1 + $0x18] sm:$0xff] (!%p139_p2)  ;;  %p163_p3 = scmp.lt.s32.totalorder (!%p139_p2), %s448_s20, 15  ;;  %v460_v14 = vld [vmem:[%s626_s2] ss:$0 sm:$0xff] (!%p139_p2) }
   0x7   : > { %v499_v5 = vpack.c.bf16 (!%p139_p2), %v186_v4, %v185_v2 }
   0x8   : > { %496 = vmatprep.subr.bf16.mxu0 (!%p139_p2), %v495_v3  ;;  %503 = vmatprep.subr.bf16.mxu1 (!%p139_p2), %v495_v3 }
   0x9   : > { %498 = vmatpush3.bf16.msra.mxu0 (!%p139_p2), %v495_v3  ;;  %505 = vmatpush3.bf16.msra.mxu1 (!%p139_p2), %v495_v3 }
   0xa   : > { %500 = vmatprep.subr.bf16.mxu0 (!%p139_p2), %v499_v5  ;;  %504 = vmatprep.subr.bf16.mxu1 (!%p139_p2), %v499_v5 }
   0xd   : > { %s629_s20 = smov (!%p163_p3, %s448_s20), 15  ;;  %502 = vmatpush3.bf16.msra.mxu0 %v499_v5  ;;  %506 = vmatpush3.bf16.msra.mxu1 %v499_v5 }
   0xe   : > { %s449_s23 = sshll.u32 %s629_s20, 3 }
   0xf   : > { %s166_s26 = scalar_lea.vmem %s624_s0, %s449_s23  ;;  %s603_s4 = scalar_lea.vmem %s627_s3, %s449_s23 }
  0x10   : > { %v175_v6 = vld [vmem:[%s166_s26] sm:$0xff]  ;;  %v176_v8 = vld [vmem:[%s166_s26 + $0x8] sm:$0xff]  ;;  %v177_v10 = vld [vmem:[%s166_s26 + $0x10] sm:$0xff] }
  0x11   : > { %v179_v7 = vld [vmem:[%s166_s26 + $0x20] sm:$0xff]  ;;  %v180_v9 = vld [vmem:[%s166_s26 + $0x28] sm:$0xff]  ;;  %483 = vmatprep.mubr.msk.f32.mxu0 %vm187_vm0, %v175_v6  ;;  %v181_v11 = vld [vmem:[%s166_s26 + $0x30] sm:$0xff] }
  0x12   : > { %489 = vmatprep.mubr.msk.f32.mxu1 %vm187_vm0, %v179_v7  ;;  %484 = vmatmul.mubr.msk.f32.vlgmr.msra.gmra.mrb[0].mxu0 %vm187_vm0, %v176_v8  ;;  %v178_v12 = vld [vmem:[%s166_s26 + $0x18] sm:$0xff] }
  0x13   : > { %490 = vmatmul.mubr.msk.f32.vlgmr.msra.gmra.mrb[0].mxu1 %vm187_vm0, %v180_v9  ;;  %486 = vmatprep.mubr.msk.f32.mxu0 %vm187_vm0, %v177_v10  ;;  %v182_v13 = vld [vmem:[%s166_s26 + $0x38] sm:$0xff] }
  0x14   : > { %492 = vmatprep.mubr.msk.f32.mxu1 %vm187_vm0, %v181_v11 }
  0x16   : > { %487 = vmatmul.mubr.msk.f32.gmra.mrb[2].mxu0 %vm187_vm0, %v178_v12 }
  0x17   : > { %493 = vmatmul.mubr.msk.f32.gmra.mrb[2].mxu1 %vm187_vm0, %v182_v13 }
  0xe5   : > { %v485_v15 = vpop.f32.mrb[0].mxu0 }
  0xe6   : > { %v491_v16 = vpop.f32.mrb[0].mxu1  ;;  %v324_v17 = vadd.f32 %v485_v15, %v460_v14  ;;  %v278_v19 = vpop.f32.mrb[1].mxu0 }
  0xe7   : > { %v328_v18 = vadd.f32 %v491_v16, %v460_v14  ;;  %v298_v20 = vpop.f32.mrb[1].mxu1  ;;  %v323_v21 = vadd.f32 %v460_v14, %v278_v19 }
  0xe8   : > { %v327_v22 = vadd.f32 %v460_v14, %v298_v20  ;;  %v348_v23 = vmin.f32 %v324_v17, 0.0  ;;  %v340_v47 = vadd.f32 1.0, %v324_v17  ;;  %vm332_vm1 = vcmp.gt.f32.partialorder %v324_v17, 0.0 }
  0xe9   : > { %v352_v24 = vmin.f32 %v328_v18, 0.0  ;;  %v488_v25 = vpop.f32.mrb[2].mxu0  ;;  %v347_v28 = vmin.f32 %v323_v21, 0.0  ;;  %v344_v49 = vadd.f32 1.0, %v328_v18  ;;  %vm336_vm2 = vcmp.gt.f32.partialorder %v328_v18, 0.0 }
  0xea   : > { %v494_v26 = vpop.f32.mrb[2].mxu1  ;;  %v357_v27 = vmul.f32 1.442695, %v348_v23  ;;  %v288_v29 = vpop.f32.mrb[3].mxu0  ;;  %v351_v31 = vmin.f32 %v327_v22, 0.0  ;;  %v326_v32 = vadd.f32 %v488_v25, %v460_v14  ;;  %v339_v52 = vadd.f32 1.0, %v323_v21 }
  0xeb   : > { %v365_v30 = vmul.f32 1.442695, %v352_v24  ;;  %v330_v33 = vadd.f32 %v494_v26, %v460_v14  ;;  %v308_v34 = vpop.f32.mrb[3].mxu1  ;;  %v355_v35 = vmul.f32 1.442695, %v347_v28  ;;  %v325_v36 = vadd.f32 %v460_v14, %v288_v29 }
  0xec   : > { %515 = vpow2.f32 %v357_v27  ;;  %v363_v37 = vmul.f32 1.442695, %v351_v31  ;;  %v329_v38 = vadd.f32 %v460_v14, %v308_v34  ;;  %v350_v39 = vmin.f32 %v326_v32, 0.0 }
  0xed   : > { %517 = vpow2.f32 %v365_v30  ;;  %v354_v40 = vmin.f32 %v330_v33, 0.0  ;;  %v349_v42 = vmin.f32 %v325_v36, 0.0  ;;  %vm331_vm3 = vcmp.gt.f32.partialorder %v323_v21, 0.0 }
  0xee   : > { %519 = vpow2.f32 %v355_v35  ;;  %v361_v41 = vmul.f32 1.442695, %v350_v39  ;;  %v353_v44 = vmin.f32 %v329_v38, 0.0  ;;  %v343_v55 = vadd.f32 1.0, %v327_v22 }
  0xef   : > { %521 = vpow2.f32 %v363_v37  ;;  %v369_v43 = vmul.f32 1.442695, %v354_v40  ;;  %v359_v45 = vmul.f32 1.442695, %v349_v42  ;;  %vm335_vm4 = vcmp.gt.f32.partialorder %v327_v22, 0.0 }
  0xf0   : > { %523 = vpow2.f32 %v361_v41  ;;  %v367_v46 = vmul.f32 1.442695, %v353_v44  ;;  %v342_v59 = vadd.f32 1.0, %v326_v32  ;;  %vm334_vm5 = vcmp.gt.f32.partialorder %v326_v32, 0.0 }
  0xf1   : > { %525 = vpow2.f32 %v369_v43  ;;  %v346_v61 = vadd.f32 1.0, %v330_v33  ;;  %vm338_vm6 = vcmp.gt.f32.partialorder %v330_v33, 0.0  ;;  %v341_v0 = vadd.f32 1.0, %v325_v36 }
  0xf2   : > { %527 = vpow2.f32 %v359_v45  ;;  %vm333_vm7 = vcmp.gt.f32.partialorder %v325_v36, 0.0  ;;  %v345_v3 = vadd.f32 1.0, %v329_v38  ;;  %vm337_vm8 = vcmp.gt.f32.partialorder %v329_v38, 0.0 }
  0xf3   : > { %529 = vpow2.f32 %v367_v46 }
  0xf6   : > { %v516_v48 = vpop.eup %515 }
  0xf7   : > { %v518_v50 = vpop.eup %517  ;;  %v372_v51 = vsel %vm332_vm1, %v340_v47, %v516_v48 }
  0xf8   : > { %v520_v53 = vpop.eup %519  ;;  %380 = vst.msk [vmem:[%s603_s4 + $0x8] sm:$0xff] %vm187_vm0, %v372_v51  ;;  %v376_v54 = vsel %vm336_vm2, %v344_v49, %v518_v50 }
  0xf9   : > { %v522_v56 = vpop.eup %521  ;;  %384 = vst.msk [vmem:[%s603_s4 + $0x28] sm:$0xff] %vm187_vm0, %v376_v54  ;;  %v371_v57 = vsel %vm331_vm3, %v339_v52, %v520_v53 }
  0xfa   : > { %379 = vst.msk [vmem:[%s603_s4] sm:$0xff] %vm187_vm0, %v371_v57  ;;  %v375_v58 = vsel %vm335_vm4, %v343_v55, %v522_v56  ;;  %v524_v60 = vpop.eup %523 }
  0xfb   : > { %383 = vst.msk [vmem:[%s603_s4 + $0x20] sm:$0xff] %vm187_vm0, %v375_v58  ;;  %v526_v62 = vpop.eup %525  ;;  %v374_v63 = vsel %vm334_vm5, %v342_v59, %v524_v60 }
  0xfc   : > { %v528_v1 = vpop.eup %527  ;;  %382 = vst.msk [vmem:[%s603_s4 + $0x18] sm:$0xff] %vm187_vm0, %v374_v63  ;;  %v378_v2 = vsel %vm338_vm6, %v346_v61, %v526_v62 }
  0xfd   : > { %v530_v4 = vpop.eup %529  ;;  %386 = vst.msk [vmem:[%s603_s4 + $0x38] sm:$0xff] %vm187_vm0, %v378_v2  ;;  %v373_v5 = vsel %vm333_vm7, %v341_v0, %v528_v1 }
  0xfe   : > { %381 = vst.msk [vmem:[%s603_s4 + $0x10] sm:$0xff] %vm187_vm0, %v373_v5  ;;  %v377_v6 = vsel %vm337_vm8, %v345_v3, %v530_v4 }
  0xff   : > { %385 = vst.msk [vmem:[%s603_s4 + $0x30] sm:$0xff] %vm187_vm0, %v377_v6 }
 0x100 PF: > { %s13_s12 = sadd.s32 1, %s537_s12  }
 0x101   : > { %p10_p4 = scmp.ge.s32.totalorder %s13_s12, 4  }
 0x103   :  { %12 = sbr.rel (!%p10_p4) target bundleno = 1 (0x1), region = 62 }

// kernel: linear_attention_forward.6
= control target key start
LH: loop header
LB: loop body
LE: loop exit
PB: predicated region body
PF: predicated region fallthrough
CT: control target
= control target key end

     0   :  { %s1172_s18 = smov 0   ;;  %s1427_s0 = inlined_call_operand.vmem [shape: f32[2,32,256], index: 0, kind: input, shape index: {}]   ;;  %s1428_s1 = inlined_call_operand.vmem [shape: f32[2,2,32,64], index: 1, kind: input, shape index: {}]   ;;  %s1429_s2 = inlined_call_operand.vmem [shape: f32[2,32,256], index: 2, kind: input, shape index: {}]   ;;  %s1430_s3 = inlined_call_operand.vmem [shape: f32[2,32,64], index: 3, kind: input, shape index: {}]   ;;  %s1431_s4 = inlined_call_operand.vmem [shape: f32[2,32,32], index: 4, kind: input, shape index: {}]   ;;  %s1432_s5 = inlined_call_operand.vmem [shape: f32[2,32,256], index: 5, kind: output, shape index: {}]  }
   0x1 LB: > { %s960_s19 = sadd.s32 4294967295, %s1139_s18   ;;  %p964_p0 = scmp.ge.s32.totalorder %s1139_s18, 1  ;;  %s1139_s18 = sphi %s1172_s18, %s15_s18  }
   0x2   : > { %p197_p1 = scmp.lt.s32.totalorder %s1139_s18, 3 }
   0x4   : > { %p198_p2 = pnand %p964_p0, %p197_p1 }
   0x5   : > { %p230_p3 = scmp.lt.s32.totalorder (!%p198_p2), %s960_s19, 1  ;;  %v262_v0 = vld [vmem:[%s1431_s4] sm:$0xff] (!%p198_p2)  ;;  %vm296_vm0 = vcmask (!%p198_p2), 261120   ;;  %vm520_vm1 = vcmask (!%p198_p2), 523264   ;;  %v263_v11 = vld [vmem:[%s1431_s4 + $0x8] sm:$0xff] (!%p198_p2)  ;;  %v264_v12 = vld [vmem:[%s1431_s4 + $0x10] sm:$0xff] (!%p198_p2) }
   0x6   : > { %201 = sbr.rel (%p198_p2) target bundleno = 705 (0x2c1), region = 40  ;;  %1044 = vmatprep.mubr.msk.f32.mxu1 (!%p198_p2), %vm296_vm0, %v262_v0  ;;  %v265_v13 = vld [vmem:[%s1431_s4 + $0x18] sm:$0xff] (!%p198_p2)  ;;  %v1141_v26 = vmov (!%p198_p2), 0.0   ;;  %v1277_v47 = vld [vmem:[%s1431_s4 + $0x20] sm:$0xff] (!%p198_p2)  ;;  %v1285_v48 = vld [vmem:[%s1431_s4 + $0x28] sm:$0xff] (!%p198_p2) }
   0x7   : > { %373 = vmatprep.mubr.f32.mxu0 (!%p198_p2), %v1141_v26  ;;  %v1293_v49 = vld [vmem:[%s1431_s4 + $0x30] sm:$0xff] (!%p198_p2)  ;;  %v1301_v50 = vld [vmem:[%s1431_s4 + $0x38] sm:$0xff] (!%p198_p2)  ;;  %v415_v52 = vld [vmem:[%s1430_s3 + $0x8] sm:$0xff] (!%p198_p2) }
   0x8   : > { %v414_v53 = vld [vmem:[%s1430_s3] sm:$0xff] (!%p198_p2)  ;;  %v992_v54 = vld [vmem:[%s1430_s3 + $0x28] sm:$0xff] (!%p198_p2)  ;;  %v417_v59 = vld [vmem:[%s1430_s3 + $0x18] sm:$0xff] (!%p198_p2) }
   0x9   : > { %v991_v56 = vld [vmem:[%s1430_s3 + $0x20] sm:$0xff] (!%p198_p2)  ;;  %v416_v62 = vld [vmem:[%s1430_s3 + $0x10] sm:$0xff] (!%p198_p2)  ;;  %vm1089_vm2 = vmpackc.low (!%p198_p2), %vm520_vm1, %vm520_vm1 }
   0xd   : > { %s1434_s19 = smov (!%p230_p3, %s960_s19), 1 }
   0xe   : > { %s1184_s22 = sshll.u32 %s1434_s19, 6 }
   0xf   : > { %s1190_s25 = scalar_lea.vmem %s1428_s1, %s1184_s22  ;;  %s234_s9 = scalar_lea.vmem %s1427_s0, %s1184_s22 }
  0x10   : > { %v1193_v1 = vld [vmem:[%s1190_s25] sm:$0xff]  ;;  %v1196_v2 = vld [vmem:[%s1190_s25 + $0x8] sm:$0xff]  ;;  %v1199_v3 = vld [vmem:[%s1190_s25 + $0x10] sm:$0xff]  ;;  %s1414_s26 = scalar_lea.vmem %s1432_s5, %s1184_s22 }
  0x11   : > { %v1072_v4 = vpack.c.bf16 %v1196_v2, %v1193_v1  ;;  %v1204_v5 = vld [vmem:[%s1190_s25 + $0x18] sm:$0xff]  ;;  %v521_v6 = vsel %vm520_vm1, %v1193_v1, 0.0  ;;  %v527_v7 = vsel %vm520_vm1, %v1199_v3, 0.0  ;;  %v524_v9 = vsel %vm520_vm1, %v1196_v2, 0.0  ;;  %v1232_v14 = vld [vmem:[%s234_s9] sm:$0xff]  ;;  %v1234_v15 = vld [vmem:[%s234_s9 + $0x28] sm:$0xff] }
  0x12   : > { %v1076_v8 = vpack.c.bf16 %v1204_v5, %v1199_v3  ;;  %522 = vadd.xlane.f32.xlu0 %v521_v6  ;;  %528 = vadd.xlane.f32.xlu1 %v527_v7  ;;  %v530_v10 = vsel %vm520_vm1, %v1204_v5, 0.0  ;;  %v1236_v16 = vld [vmem:[%s234_s9 + $0x10] sm:$0xff]  ;;  %v1238_v17 = vld [vmem:[%s234_s9 + $0x18] sm:$0xff]  ;;  %v1240_v18 = vld [vmem:[%s234_s9 + $0x8] sm:$0xff]  ;;  %v419_v55 = vmul.f32 %v415_v52, %v1196_v2  ;;  %v418_v58 = vmul.f32 %v414_v53, %v1193_v1 }
  0x13   : > { %1073 = vmatprep.subr.bf16.mxu1 %v1072_v4  ;;  %v1242_v19 = vld [vmem:[%s234_s9 + $0x38] sm:$0xff]  ;;  %v1066_v20 = vpack.c.bf16 %v1236_v16, %v1232_v14  ;;  %v1064_v21 = vpack.c.bf16 %v1238_v17, %v1240_v18  ;;  %v1250_v23 = vld [vmem:[%s234_s9 + $0x20] sm:$0xff]  ;;  %v1252_v24 = vld [vmem:[%s234_s9 + $0x30] sm:$0xff] }
  0x14   : > { %1075 = vmatpush3.bf16.msra.mxu1 %v1072_v4  ;;  %v1068_v22 = vpack.c.bf16 %v1242_v19, %v1234_v15  ;;  %v1070_v25 = vpack.c.bf16 %v1252_v24, %v1250_v23  ;;  %v971_v51 = vld [vmem:[%s1190_s25 + $0x20] sm:$0xff]  ;;  %v421_v4 = vmul.f32 %v417_v59, %v1204_v5  ;;  %v993_v1 = vld [vmem:[%s1430_s3 + $0x30] sm:$0xff]  ;;  %v276_v52 = vld [vmem:[%s1429_s2 + $0x28] sm:$0xff] }
  0x15   : > { %1077 = vmatprep.subr.bf16.mxu1 %v1076_v8  ;;  %1065 = vmatprep.subr.bf16.mxu0 %v1064_v21  ;;  %v972_v21 = vld [vmem:[%s1190_s25 + $0x28] sm:$0xff] }
  0x16   : > { %525 = vadd.xlane.f32.xlu0 %v524_v9  ;;  %531 = vadd.xlane.f32.xlu1 %v530_v10 }
  0x17   : > { %1067 = vmatpush1.bf16.msra.mxu0 %v1066_v20 }
  0x18   : > { %1079 = vmatpush3.bf16.msra.mxu1 %v1076_v8  ;;  %1069 = vmatprep.subr.bf16.mxu0 %v1068_v22  ;;  %v420_v8 = vmul.f32 %v416_v62, %v1199_v3  ;;  %v973_v22 = vld [vmem:[%s1190_s25 + $0x30] sm:$0xff]  ;;  %v271_v3 = vld [vmem:[%s1429_s2] sm:$0xff] }
  0x1b   : > { %1045 = vmatmul.mubr.msk.f32.vlgmr.msra.gmra.mrb[0].mxu1 %vm296_vm0, %v263_v11  ;;  %1071 = vmatpush1.bf16.msra.mxu0 %v1070_v25  ;;  %v979_v25 = vld [vmem:[%s1429_s2 + $0x40] sm:$0xff] }
  0x1c   : > { %1047 = vmatprep.mubr.msk.f32.mxu1 %vm296_vm0, %v264_v12 }
  0x1e   : > { %987 = vmatmul.mubr.msk.f32.vlgmr.msra.gmra.mrb[0].mxu0 %vm296_vm0, %v262_v0  ;;  %v994_v0 = vld [vmem:[%s1430_s3 + $0x38] sm:$0xff] }
  0x1f   : > { %1048 = vmatmul.mubr.msk.f32.gmra.mrb[2].mxu1 %vm296_vm0, %v265_v13  ;;  %379 = vmatprep.mubr.f32.mxu0 %v1141_v26 }
  0x20   : > { %622 = vmatprep.mubr.f32.mxu1 %v1141_v26 }
  0x22   : > { %988 = vmatmul.mubr.msk.f32.gmra.mrb[2].mxu0 %vm296_vm0, %v263_v11 }
  0x23   : > { %385 = vmatprep.mubr.f32.mxu0 %v1141_v26 }
  0x26   : > { %989 = vmatmul.mubr.msk.f32.gmra.mrb[4].mxu0 %vm296_vm0, %v264_v12 }
  0x27   : > { %391 = vmatprep.mubr.f32.mxu0 %v1141_v26 }
  0x2a   : > { %990 = vmatmul.mubr.msk.f32.gmra.mrb[6].mxu0 %vm296_vm0, %v265_v13 }
  0x2b   : > { %844 = vmatprep.mubr.f32.mxu0 %v1141_v26 }
  0x9f   : > { %v523_v27 = vpop.xlane.xlu0 %522  ;;  %v529_v28 = vpop.xlane.xlu1 %528 }
  0xa0   : > { %v534_v29 = vmul.f32 0.015625, %v523_v27  ;;  %v536_v30 = vmul.f32 0.015625, %v529_v28  ;;  %v272_v27 = vld [vmem:[%s1429_s2 + $0x8] sm:$0xff] }
  0xa1   : > { %v980_v28 = vld [vmem:[%s1429_s2 + $0x48] sm:$0xff] }
  0xa2   : > { %v538_v31 = vmul.f32 %v534_v29, %v1232_v14  ;;  %v543_v34 = vmul.f32 %v536_v30, %v1234_v15  ;;  %v539_v36 = vmul.f32 %v534_v29, %v1240_v18  ;;  %v542_v41 = vmul.f32 %v536_v30, %v1250_v23  ;;  %v273_v30 = vld [vmem:[%s1429_s2 + $0x10] sm:$0xff] }
  0xa3   : > { %v526_v32 = vpop.xlane.xlu0 %525  ;;  %v532_v33 = vpop.xlane.xlu1 %531 }
  0xa4   : > { %v535_v35 = vmul.f32 0.015625, %v526_v32  ;;  %v537_v37 = vmul.f32 0.015625, %v532_v33  ;;  %v279_v32 = vmul.f32 %v271_v3, %v1232_v14 }
  0xa6   : > { %v540_v38 = vmul.f32 %v535_v35, %v1236_v16  ;;  %v541_v39 = vmul.f32 %v535_v35, %v1238_v17  ;;  %v545_v40 = vmul.f32 %v537_v37, %v1242_v19  ;;  %v544_v42 = vmul.f32 %v537_v37, %v1252_v24  ;;  %v274_v35 = vld [vmem:[%s1429_s2 + $0x18] sm:$0xff] }
  0xa8   : > { %v1082_v43 = vpack.c.bf16 %v540_v38, %v538_v31  ;;  %v1084_v44 = vpack.c.bf16 %v545_v40, %v543_v34  ;;  %v1080_v45 = vpack.c.bf16 %v541_v39, %v539_v36  ;;  %v1086_v46 = vpack.c.bf16 %v544_v42, %v542_v41  ;;  %v974_v31 = vld [vmem:[%s1190_s25 + $0x38] sm:$0xff]  ;;  %v981_v38 = vld [vmem:[%s1429_s2 + $0x50] sm:$0xff] }
  0xa9   : > { %v280_v36 = vmul.f32 %v272_v27, %v1240_v18  ;;  %v281_v39 = vmul.f32 %v273_v30, %v1236_v16  ;;  %v982_v40 = vld [vmem:[%s1429_s2 + $0x58] sm:$0xff]  ;;  %v282_v41 = vmul.f32 %v274_v35, %v1238_v17  ;;  %v983_v16 = vld [vmem:[%s1429_s2 + $0x60] sm:$0xff]  ;;  %v984_v17 = vld [vmem:[%s1429_s2 + $0x68] sm:$0xff] }
  0xaa   : > { %1081 = vmatprep.subr.bf16.mxu1 %v1080_v45 }
  0xab   : > { %1083 = vmatpush1.bf16.msra.mxu1 %v1082_v43 }
  0xac   : > { %1085 = vmatprep.subr.bf16.mxu1 %v1084_v44 }
  0xaf   : > { %1087 = vmatpush1.bf16.msra.mxu1 %v1086_v46  ;;  %v275_v46 = vld [vmem:[%s1429_s2 + $0x20] sm:$0xff] }
  0xb2   : > { %999 = vmatmul.mubr.msk.f32.vlgmr.msra.gmra.mrb[4].mxu1 %vm296_vm0, %v1277_v47 }
  0xb3   : > { %628 = vmatprep.mubr.f32.mxu1 %v1141_v26 }
  0xb6   : > { %1000 = vmatmul.mubr.msk.f32.gmra.mrb[6].mxu1 %vm296_vm0, %v1285_v48 }
  0xb7   : > { %634 = vmatprep.mubr.f32.mxu1 %v1141_v26 }
  0xba   : > { %1001 = vmatmul.mubr.msk.f32.gmra.mrb[8].mxu1 %vm296_vm0, %v1293_v49 }
  0xbb   : > { %640 = vmatprep.mubr.f32.mxu1 %v1141_v26 }
  0xbe   : > { %1002 = vmatmul.mubr.msk.f32.gmra.mrb[10].mxu1 %vm296_vm0, %v1301_v50 }
  0xbf   : > { %1058 = vmatprep.mubr.msk.f32.mxu1 %vm520_vm1, %v971_v51 }
  0xee   : > { %v1046_v57 = vpop.f32.mrb[0].mxu1 }
  0xef   : > { %v513_v60 = vmul.f32 %v1046_v57, %v992_v54  ;;  %v493_v61 = vpop.f32.mrb[1].mxu1  ;;  %v283_v57 = vmul.f32 %v275_v46, %v1250_v23  ;;  %v986_v23 = vld [vmem:[%s1429_s2 + $0x78] sm:$0xff] }
  0xf0   : > { %v512_v63 = vmul.f32 %v991_v56, %v493_v61  ;;  %v284_v61 = vmul.f32 %v276_v52, %v1234_v15 }
  0xf1   : > { %v517_v2 = vadd.f32 %v513_v60, %v419_v55  ;;  %v375_v29 = vpop.f32.mrb[0].mxu0  ;;  %v277_v55 = vld [vmem:[%s1429_s2 + $0x30] sm:$0xff]  ;;  %v278_v60 = vld [vmem:[%s1429_s2 + $0x38] sm:$0xff] }
  0xf2   : > { %v516_v6 = vadd.f32 %v512_v63, %v418_v58  ;;  %v1049_v7 = vpop.f32.mrb[2].mxu1  ;;  %v398_v33 = vmul.f32 %v979_v25, %v375_v29  ;;  %v377_v34 = vpop.f32.mrb[1].mxu0  ;;  %v985_v63 = vld [vmem:[%s1429_s2 + $0x70] sm:$0xff] }
  0xf3   : > { %v515_v9 = vmul.f32 %v1049_v7, %v994_v0  ;;  %v503_v10 = vpop.f32.mrb[3].mxu1  ;;  %v399_v37 = vmul.f32 %v980_v28, %v377_v34 }
  0xf4   : > { %v1088_v11 = vpack.c.bf16 %v517_v2, %v516_v6  ;;  %v514_v12 = vmul.f32 %v993_v1, %v503_v10  ;;  %v406_v42 = vadd.f32 %v398_v33, %v279_v32  ;;  %v285_v2 = vmul.f32 %v277_v55, %v1252_v24 }
  0xf5   : > { %v519_v13 = vadd.f32 %v515_v9, %v421_v4  ;;  %v381_v14 = vpop.f32.mrb[2].mxu0  ;;  %v407_v18 = vadd.f32 %v399_v37, %v280_v36  ;;  %v286_v1 = vmul.f32 %v278_v60, %v1242_v19 }
  0xf6   : > { %v518_v20 = vadd.f32 %v514_v12, %v420_v8  ;;  %1090 = vmatprep.subr.msk.bf16.mxu1 %vm1089_vm2, %v1088_v11  ;;  %v400_v43 = vmul.f32 %v981_v38, %v381_v14  ;;  %v383_v44 = vpop.f32.mrb[3].mxu0 }
  0xf7   : > { %1093 = vmatpush3.bf16.xpose.msk.msra.mxu1 %vm1089_vm2, %v1088_v11  ;;  %v401_v45 = vmul.f32 %v982_v40, %v383_v44 }
  0xf8   : > { %v1094_v5 = vpack.c.bf16 %v519_v13, %v518_v20  ;;  %v408_v51 = vadd.f32 %v400_v43, %v281_v39 }
  0xf9   : > { %v409_v53 = vadd.f32 %v401_v45, %v282_v41  ;;  %v387_v54 = vpop.f32.mrb[4].mxu0 }
  0xfa   : > { %1096 = vmatprep.subr.msk.bf16.mxu1 %vm1089_vm2, %v1094_v5  ;;  %v1102_v56 = vpack.c.bf16 %v408_v51, %v406_v42  ;;  %v402_v58 = vmul.f32 %v983_v16, %v387_v54  ;;  %v389_v59 = vpop.f32.mrb[5].mxu0 }
  0xfb   : > { %v403_v62 = vmul.f32 %v984_v17, %v389_v59  ;;  %v1100_v0 = vpack.c.bf16 %v409_v53, %v407_v18 }
  0xfc   : > { %v410_v6 = vadd.f32 %v402_v58, %v283_v57 }
  0xfd   : > { %v393_v4 = vpop.f32.mrb[6].mxu0  ;;  %1101 = vmatprep.subr.bf16.mxu0 %v1100_v0  ;;  %v411_v15 = vadd.f32 %v403_v62, %v284_v61 }
  0xfe   : > { %v404_v7 = vmul.f32 %v985_v63, %v393_v4  ;;  %v395_v8 = vpop.f32.mrb[7].mxu0  ;;  %1103 = vmatpush1.bf16.msra.mxu0 %v1102_v56 }
  0xff   : > { %1099 = vmatpush3.bf16.xpose.msk.msra.mxu1 %vm1089_vm2, %v1094_v5  ;;  %v405_v9 = vmul.f32 %v986_v23, %v395_v8 }
 0x100   : > { %v412_v10 = vadd.f32 %v404_v7, %v285_v2 }
 0x101   : > { %v413_v11 = vadd.f32 %v405_v9, %v286_v1 }
 0x102   : > { %v1106_v12 = vpack.c.bf16 %v412_v10, %v410_v6 }
 0x103   : > { %v1104_v13 = vpack.c.bf16 %v413_v11, %v411_v15 }
 0x105   : > { %1105 = vmatprep.subr.bf16.mxu0 %v1104_v13 }
 0x106   : > { %1059 = vmatmul.mubr.msk.f32.vlgmr.msra.gmra.mrb[12].mxu1 %vm520_vm1, %v972_v21  ;;  %1107 = vmatpush1.bf16.msra.mxu0 %v1106_v12 }
 0x107   : > { %1061 = vmatprep.mubr.msk.f32.mxu1 %vm520_vm1, %v973_v22 }
 0x10a   : > { %1062 = vmatmul.mubr.msk.f32.gmra.mrb[14].mxu1 %vm520_vm1, %v974_v31 }
 0x185   : > { %v624_v24 = vpop.f32.mrb[4].mxu1 }
 0x186   : > { %v626_v20 = vpop.f32.mrb[5].mxu1  ;;  %v625_v34 = vadd.f32 1e-06, %v624_v24 }
 0x187   : > { %v627_v35 = vadd.f32 1e-06, %v626_v20 }
 0x188   : > { %1117 = vrcp.f32 %v625_v34 }
 0x189   : > { %v630_v5 = vpop.f32.mrb[6].mxu1  ;;  %1119 = vrcp.f32 %v627_v35 }
 0x18a   : > { %v632_v21 = vpop.f32.mrb[7].mxu1  ;;  %v631_v36 = vadd.f32 1e-06, %v630_v5 }
 0x18c   : > { %1121 = vrcp.f32 %v631_v36 }
 0x18d   : > { %v636_v22 = vpop.f32.mrb[8].mxu1 }
 0x18e   : > { %v638_v3 = vpop.f32.mrb[9].mxu1  ;;  %v637_v37 = vadd.f32 1e-06, %v636_v22 }
 0x191   : > { %v642_v25 = vpop.f32.mrb[10].mxu1 }
 0x192   : > { %v644_v19 = vpop.f32.mrb[11].mxu1  ;;  %v643_v38 = vadd.f32 1e-06, %v642_v25 }
 0x193   : > { %v645_v39 = vadd.f32 1e-06, %v644_v19 }
 0x1d9   : > { %v1060_v27 = vpop.f32.mrb[12].mxu1 }
 0x1da   : > { %v745_v28 = vpop.f32.mrb[13].mxu1  ;;  %v765_v32 = vmul.f32 %v1060_v27, %v1285_v48  ;;  %v633_v48 = vadd.f32 1e-06, %v632_v21 }
 0x1db   : > { %v764_v29 = vmul.f32 %v1277_v47, %v745_v28 }
 0x1dc   : > { %1123 = vrcp.f32 %v633_v48 }
 0x1dd   : > { %1011 = vmatmul.mubr.msk.f32.vlgmr.msra.gmra.mrb[8].mxu0 %vm296_vm0, %v764_v29  ;;  %v1063_v30 = vpop.f32.mrb[14].mxu1  ;;  %1125 = vrcp.f32 %v637_v37 }
 0x1de   : > { %850 = vmatprep.mubr.f32.mxu0 %v1141_v26  ;;  %v755_v31 = vpop.f32.mrb[15].mxu1  ;;  %v767_v47 = vmul.f32 %v1063_v30, %v1301_v50 }
 0x1df   : > { %v766_v33 = vmul.f32 %v1293_v49, %v755_v31  ;;  %v639_v49 = vadd.f32 1e-06, %v638_v3 }
 0x1e1   : > { %1012 = vmatmul.mubr.msk.f32.gmra.mrb[10].mxu0 %vm296_vm0, %v765_v32  ;;  %1127 = vrcp.f32 %v639_v49 }
 0x1e2   : > { %856 = vmatprep.mubr.f32.mxu0 %v1141_v26  ;;  %1129 = vrcp.f32 %v643_v38 }
 0x1e3   : > { %1131 = vrcp.f32 %v645_v39 }
 0x1e5   : > { %1013 = vmatmul.mubr.msk.f32.gmra.mrb[12].mxu0 %vm296_vm0, %v766_v33 }
 0x1e6   : > { %862 = vmatprep.mubr.f32.mxu0 %v1141_v26  ;;  %v1118_v26 = vpop.eup %1117 }
 0x1e7   : > { %v1120_v40 = vpop.eup %1119  ;;  %v869_v50 = vmul.f32 0.00390625, %v1118_v26 }
 0x1e8   : > { %v1122_v14 = vpop.eup %1121  ;;  %v870_v42 = vmul.f32 0.00390625, %v1120_v40 }
 0x1e9   : > { %1014 = vmatmul.mubr.msk.f32.gmra.mrb[14].mxu0 %vm296_vm0, %v767_v47  ;;  %v1124_v43 = vpop.eup %1123  ;;  %v871_v46 = vmul.f32 0.00390625, %v1122_v14 }
 0x1ea   : > { %v1126_v16 = vpop.eup %1125  ;;  %v872_v52 = vmul.f32 0.00390625, %v1124_v43 }
 0x1eb   : > { %v1128_v17 = vpop.eup %1127  ;;  %v873_v56 = vmul.f32 0.00390625, %v1126_v16 }
 0x1ec   : > { %v1130_v57 = vpop.eup %1129  ;;  %v874_v59 = vmul.f32 0.00390625, %v1128_v17 }
 0x1ed   : > { %v1132_v60 = vpop.eup %1131  ;;  %v875_v0 = vmul.f32 0.00390625, %v1130_v57 }
 0x1ee   : > { %v876_v23 = vmul.f32 0.00390625, %v1132_v60 }
 0x2b0   : > { %v846_v41 = vpop.f32.mrb[8].mxu0 }
 0x2b1   : > { %v877_v44 = vmul.f32 %v869_v50, %v846_v41  ;;  %v848_v18 = vpop.f32.mrb[9].mxu0 }
 0x2b2   : > { %v878_v45 = vmul.f32 %v870_v42, %v848_v18 }
 0x2b3   : > { %885 = vst [vmem:[%s1414_s26] sm:$0xff] %v877_v44 }
 0x2b4   : > { %886 = vst [vmem:[%s1414_s26 + $0x8] sm:$0xff] %v878_v45  ;;  %v852_v51 = vpop.f32.mrb[10].mxu0 }
 0x2b5   : > { %v879_v53 = vmul.f32 %v871_v46, %v852_v51  ;;  %v854_v54 = vpop.f32.mrb[11].mxu0 }
 0x2b6   : > { %v880_v55 = vmul.f32 %v872_v52, %v854_v54 }
 0x2b7   : > { %887 = vst [vmem:[%s1414_s26 + $0x10] sm:$0xff] %v879_v53 }
 0x2b8   : > { %888 = vst [vmem:[%s1414_s26 + $0x18] sm:$0xff] %v880_v55  ;;  %v858_v58 = vpop.f32.mrb[12].mxu0 }
 0x2b9   : > { %v881_v61 = vmul.f32 %v873_v56, %v858_v58  ;;  %v860_v62 = vpop.f32.mrb[13].mxu0 }
 0x2ba   : > { %v882_v63 = vmul.f32 %v874_v59, %v860_v62 }
 0x2bb   : > { %889 = vst [vmem:[%s1414_s26 + $0x20] sm:$0xff] %v881_v61 }
 0x2bc   : > { %890 = vst [vmem:[%s1414_s26 + $0x28] sm:$0xff] %v882_v63  ;;  %v864_v2 = vpop.f32.mrb[14].mxu0 }
 0x2bd   : > { %v883_v4 = vmul.f32 %v875_v0, %v864_v2  ;;  %v866_v1 = vpop.f32.mrb[15].mxu0 }
 0x2be   : > { %v884_v6 = vmul.f32 %v876_v23, %v866_v1 }
 0x2bf   : > { %891 = vst [vmem:[%s1414_s26 + $0x30] sm:$0xff] %v883_v4 }
 0x2c0   : > { %892 = vst [vmem:[%s1414_s26 + $0x38] sm:$0xff] %v884_v6 }
 0x2c1 PF: > { %s15_s18 = sadd.s32 1, %s1139_s18  }
 0x2c2   : > { %p12_p4 = scmp.ge.s32.totalorder %s15_s18, 4  }
 0x2c4   :  { %14 = sbr.rel (!%p12_p4) target bundleno = 1 (0x1), region = 77 }

// kernel: linear_attention_forward.7
= control target key start
LH: loop header
LB: loop body
LE: loop exit
PB: predicated region body
PF: predicated region fallthrough
CT: control target
= control target key end

     0   :  { %s1505_s18 = smov 0   ;;  %s1780_s0 = inlined_call_operand.vmem [shape: f32[512,32], index: 0, kind: input, shape index: {}]   ;;  %s1781_s1 = inlined_call_operand.vmem [shape: f32[512,8], index: 1, kind: input, shape index: {}]   ;;  %s1782_s2 = inlined_call_operand.vmem [shape: f32[32,32], index: 2, kind: input, shape index: {}]   ;;  %s1783_s3 = inlined_call_operand.vmem [shape: f32[8,32], index: 3, kind: input, shape index: {}]   ;;  %s1784_s4 = inlined_call_operand.vmem [shape: f32[1,32], index: 4, kind: input, shape index: {}]   ;;  %s1785_s5 = inlined_call_operand.vmem [shape: f32[512,32], index: 5, kind: output, shape index: {}]  }
   0x1 LB: > { %s1134_s19 = sadd.s32 4294967295, %s1473_s18   ;;  %p1138_p0 = scmp.ge.s32.totalorder %s1473_s18, 1  ;;  %s1473_s18 = sphi %s1505_s18, %s15_s18  }
   0x2   : > { %p199_p1 = scmp.lt.s32.totalorder %s1473_s18, 3 }
   0x4   : > { %p200_p2 = pnand %p1138_p0, %p199_p1 }
   0x5   : > { %v283_v0 = vld [vmem:[%s1782_s2] sm:$0xff] (!%p200_p2)  ;;  %v284_v1 = vld [vmem:[%s1782_s2 + $0x8] sm:$0xff] (!%p200_p2)  ;;  %v285_v2 = vld [vmem:[%s1782_s2 + $0x10] sm:$0xff] (!%p200_p2)  ;;  %s1139_s26 = sshll.u32 (!%p200_p2), %s1134_s19, 5  ;;  %vm287_vm0 = vcmask (!%p200_p2), 261120   ;;  %vm680_vm1 = vcmask (!%p200_p2), 64512  }
   0x6   : > { %203 = sbr.rel (%p200_p2) target bundleno = 296 (0x128), region = 40  ;;  %v1387_v3 = vpack.c.bf16 (!%p200_p2), %v284_v1, %v283_v0  ;;  %v286_v4 = vld [vmem:[%s1782_s2 + $0x18] sm:$0xff] (!%p200_p2)  ;;  %p233_p3 = scmp.lt.s32.totalorder (!%p200_p2), %s1139_s26, 63  ;;  %v679_v5 = vld [vmem:[%s1783_s3] sm:$0xff] (!%p200_p2) }
   0x7   : > { %v1391_v6 = vpack.c.bf16 (!%p200_p2), %v286_v4, %v285_v2  ;;  %1337 = vmatprep.subr.mxu0 (!%p200_p2), %v679_v5 }
   0x8   : > { %1388 = vmatprep.subr.bf16.mxu1 (!%p200_p2), %v1387_v3  ;;  %1338 = vmatpush3.msra.mxu0 (!%p200_p2), %v679_v5 }
   0x9   : > { %1390 = vmatpush3.bf16.msra.mxu1 (!%p200_p2), %v1387_v3 }
   0xa   : > { %1392 = vmatprep.subr.bf16.mxu1 (!%p200_p2), %v1391_v6 }
   0xd   : > { %s1787_s26 = smov (!%p233_p3, %s1139_s26), 63  ;;  %1394 = vmatpush3.bf16.msra.mxu1 %v1391_v6 }
   0xe   : > { %s1528_s6 = sshll.u32 %s1787_s26, 3 }
   0xf   : > { %s1534_s9 = scalar_lea.vmem %s1780_s0, %s1528_s6  ;;  %s1540_s12 = scalar_lea.vmem %s1781_s1, %s1528_s6 }
  0x10   : > { %v251_v7 = vld [vmem:[%s1534_s9] sm:$0xff]  ;;  %v252_v9 = vld [vmem:[%s1534_s9 + $0x8] sm:$0xff]  ;;  %v253_v11 = vld [vmem:[%s1534_s9 + $0x10] sm:$0xff]  ;;  %s1681_s17 = scalar_lea.vmem %s1785_s5, %s1528_s6 }
  0x11   : > { %v647_v8 = vld [vmem:[%s1540_s12] sm:$0xff]  ;;  %1289 = vmatprep.mubr.msk.f32.mxu1 %vm287_vm0, %v251_v7  ;;  %v648_v10 = vld [vmem:[%s1540_s12 + $0x8] sm:$0xff]  ;;  %v649_v12 = vld [vmem:[%s1540_s12 + $0x10] sm:$0xff] }
  0x12   : > { %1339 = vmatprep.mubr.msk.f32.mxu0 %vm680_vm1, %v647_v8  ;;  %1290 = vmatmul.mubr.msk.f32.vlgmr.msra.gmra.mrb[0].mxu1 %vm287_vm0, %v252_v9  ;;  %v650_v13 = vld [vmem:[%s1540_s12 + $0x18] sm:$0xff]  ;;  %v651_v15 = vld [vmem:[%s1540_s12 + $0x20] sm:$0xff]  ;;  %v652_v17 = vld [vmem:[%s1540_s12 + $0x28] sm:$0xff] }
  0x13   : > { %1340 = vmatmul.mubr.msk.f32.vlgmr.msra.gmra.mrb[0].mxu0 %vm680_vm1, %v648_v10  ;;  %1292 = vmatprep.mubr.msk.f32.mxu1 %vm287_vm0, %v253_v11  ;;  %v254_v14 = vld [vmem:[%s1534_s9 + $0x18] sm:$0xff]  ;;  %v255_v16 = vld [vmem:[%s1534_s9 + $0x20] sm:$0xff]  ;;  %v256_v18 = vld [vmem:[%s1534_s9 + $0x28] sm:$0xff] }
  0x14   : > { %1342 = vmatprep.mubr.msk.f32.mxu0 %vm680_vm1, %v649_v12  ;;  %v653_v19 = vld [vmem:[%s1540_s12 + $0x30] sm:$0xff]  ;;  %v654_v21 = vld [vmem:[%s1540_s12 + $0x38] sm:$0xff]  ;;  %v655_v23 = vld [vmem:[%s1540_s12 + $0x40] sm:$0xff] }
  0x15   : > { %v257_v20 = vld [vmem:[%s1534_s9 + $0x30] sm:$0xff]  ;;  %v258_v22 = vld [vmem:[%s1534_s9 + $0x38] sm:$0xff]  ;;  %v259_v24 = vld [vmem:[%s1534_s9 + $0x40] sm:$0xff] }
  0x16   : > { %1293 = vmatmul.mubr.msk.f32.gmra.mrb[2].mxu1 %vm287_vm0, %v254_v14  ;;  %v656_v25 = vld [vmem:[%s1540_s12 + $0x48] sm:$0xff]  ;;  %v657_v27 = vld [vmem:[%s1540_s12 + $0x50] sm:$0xff]  ;;  %v658_v29 = vld [vmem:[%s1540_s12 + $0x58] sm:$0xff] }
  0x17   : > { %1343 = vmatmul.mubr.msk.f32.gmra.mrb[2].mxu0 %vm680_vm1, %v650_v13  ;;  %1295 = vmatprep.mubr.msk.f32.mxu1 %vm287_vm0, %v255_v16  ;;  %v260_v26 = vld [vmem:[%s1534_s9 + $0x48] sm:$0xff]  ;;  %v261_v28 = vld [vmem:[%s1534_s9 + $0x50] sm:$0xff]  ;;  %v262_v30 = vld [vmem:[%s1534_s9 + $0x58] sm:$0xff] }
  0x18   : > { %1345 = vmatprep.mubr.msk.f32.mxu0 %vm680_vm1, %v651_v15  ;;  %v659_v31 = vld [vmem:[%s1540_s12 + $0x60] sm:$0xff]  ;;  %v660_v33 = vld [vmem:[%s1540_s12 + $0x68] sm:$0xff]  ;;  %v661_v35 = vld [vmem:[%s1540_s12 + $0x70] sm:$0xff] }
  0x19   : > { %v263_v32 = vld [vmem:[%s1534_s9 + $0x60] sm:$0xff]  ;;  %v264_v34 = vld [vmem:[%s1534_s9 + $0x68] sm:$0xff]  ;;  %v265_v36 = vld [vmem:[%s1534_s9 + $0x70] sm:$0xff] }
  0x1a   : > { %1296 = vmatmul.mubr.msk.f32.gmra.mrb[4].mxu1 %vm287_vm0, %v256_v18  ;;  %v662_v37 = vld [vmem:[%s1540_s12 + $0x78] sm:$0xff]  ;;  %v663_v39 = vld [vmem:[%s1540_s12 + $0x80] sm:$0xff]  ;;  %v664_v41 = vld [vmem:[%s1540_s12 + $0x88] sm:$0xff] }
  0x1b   : > { %1346 = vmatmul.mubr.msk.f32.gmra.mrb[4].mxu0 %vm680_vm1, %v652_v17  ;;  %1298 = vmatprep.mubr.msk.f32.mxu1 %vm287_vm0, %v257_v20  ;;  %v266_v38 = vld [vmem:[%s1534_s9 + $0x78] sm:$0xff]  ;;  %v267_v40 = vld [vmem:[%s1534_s9 + $0x80] sm:$0xff]  ;;  %v268_v42 = vld [vmem:[%s1534_s9 + $0x88] sm:$0xff] }
  0x1c   : > { %1348 = vmatprep.mubr.msk.f32.mxu0 %vm680_vm1, %v653_v19  ;;  %v665_v43 = vld [vmem:[%s1540_s12 + $0x90] sm:$0xff]  ;;  %v666_v45 = vld [vmem:[%s1540_s12 + $0x98] sm:$0xff]  ;;  %v667_v47 = vld [vmem:[%s1540_s12 + $0xa0] sm:$0xff] }
  0x1d   : > { %v269_v44 = vld [vmem:[%s1534_s9 + $0x90] sm:$0xff]  ;;  %v270_v46 = vld [vmem:[%s1534_s9 + $0x98] sm:$0xff]  ;;  %v271_v48 = vld [vmem:[%s1534_s9 + $0xa0] sm:$0xff] }
  0x1e   : > { %1299 = vmatmul.mubr.msk.f32.gmra.mrb[6].mxu1 %vm287_vm0, %v258_v22  ;;  %v668_v49 = vld [vmem:[%s1540_s12 + $0xa8] sm:$0xff]  ;;  %v669_v51 = vld [vmem:[%s1540_s12 + $0xb0] sm:$0xff]  ;;  %v670_v53 = vld [vmem:[%s1540_s12 + $0xb8] sm:$0xff] }
  0x1f   : > { %1349 = vmatmul.mubr.msk.f32.gmra.mrb[6].mxu0 %vm680_vm1, %v654_v21  ;;  %1301 = vmatprep.mubr.msk.f32.mxu1 %vm287_vm0, %v259_v24  ;;  %v272_v50 = vld [vmem:[%s1534_s9 + $0xa8] sm:$0xff]  ;;  %v273_v52 = vld [vmem:[%s1534_s9 + $0xb0] sm:$0xff]  ;;  %v274_v54 = vld [vmem:[%s1534_s9 + $0xb8] sm:$0xff] }
  0x20   : > { %1351 = vmatprep.mubr.msk.f32.mxu0 %vm680_vm1, %v655_v23  ;;  %v671_v55 = vld [vmem:[%s1540_s12 + $0xc0] sm:$0xff]  ;;  %v672_v57 = vld [vmem:[%s1540_s12 + $0xc8] sm:$0xff]  ;;  %v673_v59 = vld [vmem:[%s1540_s12 + $0xd0] sm:$0xff] }
  0x21   : > { %v275_v56 = vld [vmem:[%s1534_s9 + $0xc0] sm:$0xff]  ;;  %v276_v58 = vld [vmem:[%s1534_s9 + $0xc8] sm:$0xff]  ;;  %v277_v60 = vld [vmem:[%s1534_s9 + $0xd0] sm:$0xff] }
  0x22   : > { %1302 = vmatmul.mubr.msk.f32.gmra.mrb[8].mxu1 %vm287_vm0, %v260_v26  ;;  %v674_v61 = vld [vmem:[%s1540_s12 + $0xd8] sm:$0xff]  ;;  %v675_v63 = vld [vmem:[%s1540_s12 + $0xe0] sm:$0xff]  ;;  %v676_v1 = vld [vmem:[%s1540_s12 + $0xe8] sm:$0xff] }
  0x23   : > { %1352 = vmatmul.mubr.msk.f32.gmra.mrb[8].mxu0 %vm680_vm1, %v656_v25  ;;  %1304 = vmatprep.mubr.msk.f32.mxu1 %vm287_vm0, %v261_v28  ;;  %v278_v62 = vld [vmem:[%s1534_s9 + $0xd8] sm:$0xff]  ;;  %v279_v0 = vld [vmem:[%s1534_s9 + $0xe0] sm:$0xff]  ;;  %v280_v2 = vld [vmem:[%s1534_s9 + $0xe8] sm:$0xff] }
  0x24   : > { %1354 = vmatprep.mubr.msk.f32.mxu0 %vm680_vm1, %v657_v27  ;;  %v677_v3 = vld [vmem:[%s1540_s12 + $0xf0] sm:$0xff]  ;;  %v678_v5 = vld [vmem:[%s1540_s12 + $0xf8] sm:$0xff]  ;;  %v1673_v7 = vld [vmem:[%s1784_s4] ss:$0 sm:$0xff] }
  0x25   : > { %v281_v4 = vld [vmem:[%s1534_s9 + $0xf0] sm:$0xff]  ;;  %v282_v6 = vld [vmem:[%s1534_s9 + $0xf8] sm:$0xff] }
  0x26   : > { %1305 = vmatmul.mubr.msk.f32.gmra.mrb[10].mxu1 %vm287_vm0, %v262_v30 }
  0x27   : > { %1355 = vmatmul.mubr.msk.f32.gmra.mrb[10].mxu0 %vm680_vm1, %v658_v29  ;;  %1307 = vmatprep.mubr.msk.f32.mxu1 %vm287_vm0, %v263_v32 }
  0x28   : > { %1357 = vmatprep.mubr.msk.f32.mxu0 %vm680_vm1, %v659_v31 }
  0x2a   : > { %1308 = vmatmul.mubr.msk.f32.gmra.mrb[12].mxu1 %vm287_vm0, %v264_v34 }
  0x2b   : > { %1358 = vmatmul.mubr.msk.f32.gmra.mrb[12].mxu0 %vm680_vm1, %v660_v33  ;;  %1310 = vmatprep.mubr.msk.f32.mxu1 %vm287_vm0, %v265_v36 }
  0x2c   : > { %1360 = vmatprep.mubr.msk.f32.mxu0 %vm680_vm1, %v661_v35 }
  0x2e   : > { %1311 = vmatmul.mubr.msk.f32.gmra.mrb[14].mxu1 %vm287_vm0, %v266_v38 }
  0x2f   : > { %1361 = vmatmul.mubr.msk.f32.gmra.mrb[14].mxu0 %vm680_vm1, %v662_v37  ;;  %1313 = vmatprep.mubr.msk.f32.mxu1 %vm287_vm0, %v267_v40 }
  0x30   : > { %1363 = vmatprep.mubr.msk.f32.mxu0 %vm680_vm1, %v663_v39 }
  0x32   : > { %1314 = vmatmul.mubr.msk.f32.gmra.mrb[16].mxu1 %vm287_vm0, %v268_v42 }
  0x33   : > { %1364 = vmatmul.mubr.msk.f32.gmra.mrb[16].mxu0 %vm680_vm1, %v664_v41  ;;  %1316 = vmatprep.mubr.msk.f32.mxu1 %vm287_vm0, %v269_v44 }
  0x34   : > { %1366 = vmatprep.mubr.msk.f32.mxu0 %vm680_vm1, %v665_v43 }
  0x36   : > { %1317 = vmatmul.mubr.msk.f32.gmra.mrb[18].mxu1 %vm287_vm0, %v270_v46 }
  0x37   : > { %1367 = vmatmul.mubr.msk.f32.gmra.mrb[18].mxu0 %vm680_vm1, %v666_v45  ;;  %1319 = vmatprep.mubr.msk.f32.mxu1 %vm287_vm0, %v271_v48 }
  0x38   : > { %1369 = vmatprep.mubr.msk.f32.mxu0 %vm680_vm1, %v667_v47 }
  0x3a   : > { %1320 = vmatmul.mubr.msk.f32.gmra.mrb[20].mxu1 %vm287_vm0, %v272_v50 }
  0x3b   : > { %1370 = vmatmul.mubr.msk.f32.gmra.mrb[20].mxu0 %vm680_vm1, %v668_v49  ;;  %1322 = vmatprep.mubr.msk.f32.mxu1 %vm287_vm0, %v273_v52 }
  0x3c   : > { %1372 = vmatprep.mubr.msk.f32.mxu0 %vm680_vm1, %v669_v51 }
  0x3e   : > { %1323 = vmatmul.mubr.msk.f32.gmra.mrb[22].mxu1 %vm287_vm0, %v274_v54 }
  0x3f   : > { %1373 = vmatmul.mubr.msk.f32.gmra.mrb[22].mxu0 %vm680_vm1, %v670_v53  ;;  %1325 = vmatprep.mubr.msk.f32.mxu1 %vm287_vm0, %v275_v56 }
  0x40   : > { %1375 = vmatprep.mubr.msk.f32.mxu0 %vm680_vm1, %v671_v55 }
  0x42   : > { %1326 = vmatmul.mubr.msk.f32.gmra.mrb[24].mxu1 %vm287_vm0, %v276_v58 }
  0x43   : > { %1376 = vmatmul.mubr.msk.f32.gmra.mrb[24].mxu0 %vm680_vm1, %v672_v57  ;;  %1328 = vmatprep.mubr.msk.f32.mxu1 %vm287_vm0, %v277_v60 }
  0x44   : > { %1378 = vmatprep.mubr.msk.f32.mxu0 %vm680_vm1, %v673_v59 }
  0x46   : > { %1329 = vmatmul.mubr.msk.f32.gmra.mrb[26].mxu1 %vm287_vm0, %v278_v62 }
  0x47   : > { %1379 = vmatmul.mubr.msk.f32.gmra.mrb[26].mxu0 %vm680_vm1, %v674_v61  ;;  %1331 = vmatprep.mubr.msk.f32.mxu1 %vm287_vm0, %v279_v0 }
  0x48   : > { %1381 = vmatprep.mubr.msk.f32.mxu0 %vm680_vm1, %v675_v63 }
  0x4a   : > { %1332 = vmatmul.mubr.msk.f32.gmra.mrb[28].mxu1 %vm287_vm0, %v280_v2 }
  0x4b   : > { %1382 = vmatmul.mubr.msk.f32.gmra.mrb[28].mxu0 %vm680_vm1, %v676_v1  ;;  %1334 = vmatprep.mubr.msk.f32.mxu1 %vm287_vm0, %v281_v4 }
  0x4c   : > { %1384 = vmatprep.mubr.msk.f32.mxu0 %vm680_vm1, %v677_v3 }
  0x4e   : > { %1335 = vmatmul.mubr.msk.f32.gmra.mrb[30].mxu1 %vm287_vm0, %v282_v6 }
  0x4f   : > { %1385 = vmatmul.mubr.msk.f32.gmra.mrb[30].mxu0 %vm680_vm1, %v678_v5 }
  0xe5   : > { %v1291_v9 = vpop.f32.mrb[0].mxu1 }
  0xe6   : > { %v1341_v8 = vpop.f32.mrb[0].mxu0  ;;  %v616_v11 = vadd.f32 %v1291_v9, %v1673_v7  ;;  %v450_v12 = vpop.f32.mrb[1].mxu1 }
  0xe7   : > { %v843_v10 = vpop.f32.mrb[1].mxu0  ;;  %v615_v13 = vadd.f32 %v1673_v7, %v450_v12 }
  0xe8   : > { %v1003_v14 = vadd.f32 %v1341_v8, %v616_v11 }
  0xe9   : > { %v1002_v16 = vadd.f32 %v843_v10, %v615_v13  ;;  %v1294_v17 = vpop.f32.mrb[2].mxu1 }
  0xea   : > { %v1344_v15 = vpop.f32.mrb[2].mxu0  ;;  %1035 = vst.msk [vmem:[%s1681_s17 + $0x8] sm:$0xff] %vm287_vm0, %v1003_v14  ;;  %v618_v19 = vadd.f32 %v1294_v17, %v1673_v7  ;;  %v460_v20 = vpop.f32.mrb[3].mxu1 }
  0xeb   : > { %v853_v18 = vpop.f32.mrb[3].mxu0  ;;  %1034 = vst.msk [vmem:[%s1681_s17] sm:$0xff] %vm287_vm0, %v1002_v16  ;;  %v617_v21 = vadd.f32 %v1673_v7, %v460_v20 }
  0xec   : > { %v1005_v22 = vadd.f32 %v1344_v15, %v618_v19 }
  0xed   : > { %v1004_v24 = vadd.f32 %v853_v18, %v617_v21  ;;  %v1297_v25 = vpop.f32.mrb[4].mxu1 }
  0xee   : > { %v1347_v23 = vpop.f32.mrb[4].mxu0  ;;  %1037 = vst.msk [vmem:[%s1681_s17 + $0x18] sm:$0xff] %vm287_vm0, %v1005_v22  ;;  %v620_v27 = vadd.f32 %v1297_v25, %v1673_v7  ;;  %v470_v28 = vpop.f32.mrb[5].mxu1 }
  0xef   : > { %v863_v26 = vpop.f32.mrb[5].mxu0  ;;  %1036 = vst.msk [vmem:[%s1681_s17 + $0x10] sm:$0xff] %vm287_vm0, %v1004_v24  ;;  %v619_v29 = vadd.f32 %v1673_v7, %v470_v28 }
  0xf0   : > { %v1007_v30 = vadd.f32 %v1347_v23, %v620_v27 }
  0xf1   : > { %v1006_v32 = vadd.f32 %v863_v26, %v619_v29  ;;  %v1300_v33 = vpop.f32.mrb[6].mxu1 }
  0xf2   : > { %v1350_v31 = vpop.f32.mrb[6].mxu0  ;;  %1039 = vst.msk [vmem:[%s1681_s17 + $0x28] sm:$0xff] %vm287_vm0, %v1007_v30  ;;  %v622_v35 = vadd.f32 %v1300_v33, %v1673_v7  ;;  %v480_v36 = vpop.f32.mrb[7].mxu1 }
  0xf3   : > { %v873_v34 = vpop.f32.mrb[7].mxu0  ;;  %1038 = vst.msk [vmem:[%s1681_s17 + $0x20] sm:$0xff] %vm287_vm0, %v1006_v32  ;;  %v621_v37 = vadd.f32 %v1673_v7, %v480_v36 }
  0xf4   : > { %v1009_v38 = vadd.f32 %v1350_v31, %v622_v35 }
  0xf5   : > { %v1008_v40 = vadd.f32 %v873_v34, %v621_v37  ;;  %v1303_v41 = vpop.f32.mrb[8].mxu1 }
  0xf6   : > { %v1353_v39 = vpop.f32.mrb[8].mxu0  ;;  %1041 = vst.msk [vmem:[%s1681_s17 + $0x38] sm:$0xff] %vm287_vm0, %v1009_v38  ;;  %v624_v43 = vadd.f32 %v1303_v41, %v1673_v7  ;;  %v490_v44 = vpop.f32.mrb[9].mxu1 }
  0xf7   : > { %v883_v42 = vpop.f32.mrb[9].mxu0  ;;  %1040 = vst.msk [vmem:[%s1681_s17 + $0x30] sm:$0xff] %vm287_vm0, %v1008_v40  ;;  %v623_v45 = vadd.f32 %v1673_v7, %v490_v44 }
  0xf8   : > { %v1011_v46 = vadd.f32 %v1353_v39, %v624_v43 }
  0xf9   : > { %v1010_v48 = vadd.f32 %v883_v42, %v623_v45  ;;  %v1306_v49 = vpop.f32.mrb[10].mxu1 }
  0xfa   : > { %v1356_v47 = vpop.f32.mrb[10].mxu0  ;;  %1043 = vst.msk [vmem:[%s1681_s17 + $0x48] sm:$0xff] %vm287_vm0, %v1011_v46  ;;  %v626_v51 = vadd.f32 %v1306_v49, %v1673_v7  ;;  %v500_v52 = vpop.f32.mrb[11].mxu1 }
  0xfb   : > { %v893_v50 = vpop.f32.mrb[11].mxu0  ;;  %1042 = vst.msk [vmem:[%s1681_s17 + $0x40] sm:$0xff] %vm287_vm0, %v1010_v48  ;;  %v625_v53 = vadd.f32 %v1673_v7, %v500_v52 }
  0xfc   : > { %v1013_v54 = vadd.f32 %v1356_v47, %v626_v51 }
  0xfd   : > { %v1012_v56 = vadd.f32 %v893_v50, %v625_v53  ;;  %v1309_v57 = vpop.f32.mrb[12].mxu1 }
  0xfe   : > { %v1359_v55 = vpop.f32.mrb[12].mxu0  ;;  %1045 = vst.msk [vmem:[%s1681_s17 + $0x58] sm:$0xff] %vm287_vm0, %v1013_v54  ;;  %v628_v59 = vadd.f32 %v1309_v57, %v1673_v7  ;;  %v510_v60 = vpop.f32.mrb[13].mxu1 }
  0xff   : > { %v903_v58 = vpop.f32.mrb[13].mxu0  ;;  %1044 = vst.msk [vmem:[%s1681_s17 + $0x50] sm:$0xff] %vm287_vm0, %v1012_v56  ;;  %v627_v61 = vadd.f32 %v1673_v7, %v510_v60 }
 0x100   : > { %v1015_v62 = vadd.f32 %v1359_v55, %v628_v59 }
 0x101   : > { %v1014_v0 = vadd.f32 %v903_v58, %v627_v61  ;;  %v1312_v1 = vpop.f32.mrb[14].mxu1 }
 0x102   : > { %v1362_v63 = vpop.f32.mrb[14].mxu0  ;;  %1047 = vst.msk [vmem:[%s1681_s17 + $0x68] sm:$0xff] %vm287_vm0, %v1015_v62  ;;  %v630_v3 = vadd.f32 %v1312_v1, %v1673_v7  ;;  %v520_v4 = vpop.f32.mrb[15].mxu1 }
 0x103   : > { %v913_v2 = vpop.f32.mrb[15].mxu0  ;;  %1046 = vst.msk [vmem:[%s1681_s17 + $0x60] sm:$0xff] %vm287_vm0, %v1014_v0  ;;  %v629_v5 = vadd.f32 %v1673_v7, %v520_v4 }
 0x104   : > { %v1017_v6 = vadd.f32 %v1362_v63, %v630_v3 }
 0x105   : > { %v1016_v9 = vadd.f32 %v913_v2, %v629_v5  ;;  %v1315_v10 = vpop.f32.mrb[16].mxu1 }
 0x106   : > { %v1365_v8 = vpop.f32.mrb[16].mxu0  ;;  %1049 = vst.msk [vmem:[%s1681_s17 + $0x78] sm:$0xff] %vm287_vm0, %v1017_v6  ;;  %v632_v12 = vadd.f32 %v1315_v10, %v1673_v7  ;;  %v530_v13 = vpop.f32.mrb[17].mxu1 }
 0x107   : > { %v923_v11 = vpop.f32.mrb[17].mxu0  ;;  %1048 = vst.msk [vmem:[%s1681_s17 + $0x70] sm:$0xff] %vm287_vm0, %v1016_v9  ;;  %v631_v14 = vadd.f32 %v1673_v7, %v530_v13 }
 0x108   : > { %v1019_v15 = vadd.f32 %v1365_v8, %v632_v12 }
 0x109   : > { %v1018_v17 = vadd.f32 %v923_v11, %v631_v14  ;;  %v1318_v18 = vpop.f32.mrb[18].mxu1 }
 0x10a   : > { %v1368_v16 = vpop.f32.mrb[18].mxu0  ;;  %1051 = vst.msk [vmem:[%s1681_s17 + $0x88] sm:$0xff] %vm287_vm0, %v1019_v15  ;;  %v634_v20 = vadd.f32 %v1318_v18, %v1673_v7  ;;  %v540_v21 = vpop.f32.mrb[19].mxu1 }
 0x10b   : > { %v933_v19 = vpop.f32.mrb[19].mxu0  ;;  %1050 = vst.msk [vmem:[%s1681_s17 + $0x80] sm:$0xff] %vm287_vm0, %v1018_v17  ;;  %v633_v22 = vadd.f32 %v1673_v7, %v540_v21 }
 0x10c   : > { %v1021_v23 = vadd.f32 %v1368_v16, %v634_v20 }
 0x10d   : > { %v1020_v25 = vadd.f32 %v933_v19, %v633_v22  ;;  %v1321_v26 = vpop.f32.mrb[20].mxu1 }
 0x10e   : > { %v1371_v24 = vpop.f32.mrb[20].mxu0  ;;  %1053 = vst.msk [vmem:[%s1681_s17 + $0x98] sm:$0xff] %vm287_vm0, %v1021_v23  ;;  %v636_v28 = vadd.f32 %v1321_v26, %v1673_v7  ;;  %v550_v29 = vpop.f32.mrb[21].mxu1 }
 0x10f   : > { %v943_v27 = vpop.f32.mrb[21].mxu0  ;;  %1052 = vst.msk [vmem:[%s1681_s17 + $0x90] sm:$0xff] %vm287_vm0, %v1020_v25  ;;  %v635_v30 = vadd.f32 %v1673_v7, %v550_v29 }
 0x110   : > { %v1023_v31 = vadd.f32 %v1371_v24, %v636_v28 }
 0x111   : > { %v1022_v33 = vadd.f32 %v943_v27, %v635_v30  ;;  %v1324_v34 = vpop.f32.mrb[22].mxu1 }
 0x112   : > { %v1374_v32 = vpop.f32.mrb[22].mxu0  ;;  %1055 = vst.msk [vmem:[%s1681_s17 + $0xa8] sm:$0xff] %vm287_vm0, %v1023_v31  ;;  %v638_v36 = vadd.f32 %v1324_v34, %v1673_v7  ;;  %v560_v37 = vpop.f32.mrb[23].mxu1 }
 0x113   : > { %v953_v35 = vpop.f32.mrb[23].mxu0  ;;  %1054 = vst.msk [vmem:[%s1681_s17 + $0xa0] sm:$0xff] %vm287_vm0, %v1022_v33  ;;  %v637_v38 = vadd.f32 %v1673_v7, %v560_v37 }
 0x114   : > { %v1025_v39 = vadd.f32 %v1374_v32, %v638_v36 }
 0x115   : > { %v1024_v41 = vadd.f32 %v953_v35, %v637_v38  ;;  %v1327_v42 = vpop.f32.mrb[24].mxu1 }
 0x116   : > { %v1377_v40 = vpop.f32.mrb[24].mxu0  ;;  %1057 = vst.msk [vmem:[%s1681_s17 + $0xb8] sm:$0xff] %vm287_vm0, %v1025_v39  ;;  %v640_v44 = vadd.f32 %v1327_v42, %v1673_v7  ;;  %v570_v45 = vpop.f32.mrb[25].mxu1 }
 0x117   : > { %v963_v43 = vpop.f32.mrb[25].mxu0  ;;  %1056 = vst.msk [vmem:[%s1681_s17 + $0xb0] sm:$0xff] %vm287_vm0, %v1024_v41  ;;  %v639_v46 = vadd.f32 %v1673_v7, %v570_v45 }
 0x118   : > { %v1027_v47 = vadd.f32 %v1377_v40, %v640_v44 }
 0x119   : > { %v1026_v49 = vadd.f32 %v963_v43, %v639_v46  ;;  %v1330_v50 = vpop.f32.mrb[26].mxu1 }
 0x11a   : > { %v1380_v48 = vpop.f32.mrb[26].mxu0  ;;  %1059 = vst.msk [vmem:[%s1681_s17 + $0xc8] sm:$0xff] %vm287_vm0, %v1027_v47  ;;  %v642_v52 = vadd.f32 %v1330_v50, %v1673_v7  ;;  %v580_v53 = vpop.f32.mrb[27].mxu1 }
 0x11b   : > { %v973_v51 = vpop.f32.mrb[27].mxu0  ;;  %1058 = vst.msk [vmem:[%s1681_s17 + $0xc0] sm:$0xff] %vm287_vm0, %v1026_v49  ;;  %v641_v54 = vadd.f32 %v1673_v7, %v580_v53 }
 0x11c   : > { %v1029_v55 = vadd.f32 %v1380_v48, %v642_v52 }
 0x11d   : > { %v1028_v57 = vadd.f32 %v973_v51, %v641_v54  ;;  %v1333_v58 = vpop.f32.mrb[28].mxu1 }
 0x11e   : > { %v1383_v56 = vpop.f32.mrb[28].mxu0  ;;  %1061 = vst.msk [vmem:[%s1681_s17 + $0xd8] sm:$0xff] %vm287_vm0, %v1029_v55  ;;  %v644_v60 = vadd.f32 %v1333_v58, %v1673_v7  ;;  %v590_v61 = vpop.f32.mrb[29].mxu1 }
 0x11f   : > { %v983_v59 = vpop.f32.mrb[29].mxu0  ;;  %1060 = vst.msk [vmem:[%s1681_s17 + $0xd0] sm:$0xff] %vm287_vm0, %v1028_v57  ;;  %v643_v62 = vadd.f32 %v1673_v7, %v590_v61 }
 0x120   : > { %v1031_v63 = vadd.f32 %v1383_v56, %v644_v60 }
 0x121   : > { %v1030_v1 = vadd.f32 %v983_v59, %v643_v62  ;;  %v1336_v2 = vpop.f32.mrb[30].mxu1 }
 0x122   : > { %v1386_v0 = vpop.f32.mrb[30].mxu0  ;;  %1063 = vst.msk [vmem:[%s1681_s17 + $0xe8] sm:$0xff] %vm287_vm0, %v1031_v63  ;;  %v646_v4 = vadd.f32 %v1336_v2, %v1673_v7  ;;  %v600_v5 = vpop.f32.mrb[31].mxu1 }
 0x123   : > { %v993_v3 = vpop.f32.mrb[31].mxu0  ;;  %1062 = vst.msk [vmem:[%s1681_s17 + $0xe0] sm:$0xff] %vm287_vm0, %v1030_v1  ;;  %v645_v6 = vadd.f32 %v1673_v7, %v600_v5 }
 0x124   : > { %v1033_v8 = vadd.f32 %v1386_v0, %v646_v4 }
 0x125   : > { %v1032_v9 = vadd.f32 %v993_v3, %v645_v6 }
 0x126   : > { %1065 = vst.msk [vmem:[%s1681_s17 + $0xf8] sm:$0xff] %vm287_vm0, %v1033_v8 }
 0x127   : > { %1064 = vst.msk [vmem:[%s1681_s17 + $0xf0] sm:$0xff] %vm287_vm0, %v1032_v9 }
 0x128 PF: > { %s15_s18 = sadd.s32 1, %s1473_s18  }
 0x129   : > { %p12_p4 = scmp.ge.s32.totalorder %s15_s18, 4  }
 0x12b   :  { %14 = sbr.rel (!%p12_p4) target bundleno = 1 (0x1), region = 73 }

</bundles_post_ra>
